<compile_context>
chip_gen: v7x
topology: tpu7x:2x2x1
jax: 0.10.0
libtpu: 0.0.40
codegen_flags: <defaults>
</compile_context>

<pallas_src>
import functools
import math

import jax
import jax.numpy as jnp
from jax.experimental import pallas as pl
from jax.experimental.pallas import tpu as pltpu

_VMEM_SPEC = pl.BlockSpec(memory_space=pltpu.MemorySpace.VMEM)
_EPS = 1e-5          # nn.BatchNorm2d default eps
_LANE = 128


# ---------------------------------------------------------------- kernels ---

def _stft_mag_kernel(fr_ref, cos_ref, sin_ref, o_ref):
    """|STFT| fused: o = sqrt((fr@cos)^2 + (fr@sin)^2); norm folded into cos/sin."""
    fr = fr_ref[...]
    re = jnp.dot(fr, cos_ref[...], preferred_element_type=jnp.float32)
    im = jnp.dot(fr, sin_ref[...], preferred_element_type=jnp.float32)
    o_ref[...] = jnp.sqrt(re * re + im * im)


def _block_front_kernel(cols_ref, wf_ref, sf_ref, h_ref, res_ref):
    """ONE matmul for conv1 AND the downsample conv (shared A operand).

    wf = [bn1-folded conv1 | bnd-folded convd]  (K, 2*Cn);  sf = folded shifts.
      h   = relu(acc[:, :Cn])   (bf16, lane-dense)
      res = acc[:, Cn:]         (f32 residual, lane-dense)
    """
    acc = (jnp.dot(cols_ref[...], wf_ref[...], preferred_element_type=jnp.float32)
           + sf_ref[...])
    cn = h_ref.shape[-1]
    h_ref[...] = jnp.maximum(acc[:, :cn], 0.0).astype(h_ref.dtype)
    res_ref[...] = acc[:, cn:]


def _block_back_kernel(cols_ref, w2_ref, s2_ref, res_ref, o_ref):
    """o = cols @ w2 + s2 + res   (conv2 + bn2 shift + residual add fused)."""
    acc = jnp.dot(cols_ref[...], w2_ref[...], preferred_element_type=jnp.float32)
    o_ref[...] = acc + s2_ref[...] + res_ref[...]


def _elu(x):
    # exp(min(x,0)) avoids inf; TODO(synk): use expm1 once Mosaic lowers expm1_p.
    return jnp.where(x > 0, x, jnp.exp(jnp.minimum(x, 0.0)) - 1.0)


def _tail_kernel(*refs, n_blocks):
    """Entire back half of the network in one launch.

    Every tail ResBlock has a 1x1-spatial conv output, so conv1/convd/conv2
    reduce to dense matmuls over pack-time-selected taps:
        acc = h @ [w1|wd] + [s1|sd]; hb = relu(acc[:,:Cn]); res = acc[:,Cn:]
        h   = hb @ w2 + s2 + res     (maxpool on 1x1 & eval Dropout = identity)
    followed by the fused ELU + Linear classifier.
    """
    cls_w_ref = refs[1 + 4 * n_blocks]
    cls_b_ref = refs[2 + 4 * n_blocks]
    out_ref = refs[3 + 4 * n_blocks]

    h = refs[0][...]
    for i in range(n_blocks):
        wf, sf, w2, s2 = refs[1 + 4 * i: 5 + 4 * i]
        acc = (jnp.dot(h.astype(jnp.bfloat16), wf[...],
                       preferred_element_type=jnp.float32) + sf[...])
        cn = acc.shape[-1] // 2
        hb = jnp.maximum(acc[:, :cn], 0.0)
        h = (jnp.dot(hb.astype(jnp.bfloat16), w2[...],
                     preferred_element_type=jnp.float32)
             + s2[...] + acc[:, cn:])
    e = _elu(h)
    out_ref[...] = (jnp.dot(e.astype(jnp.bfloat16), cls_w_ref[...],
                            preferred_element_type=jnp.float32) + cls_b_ref[...])


# --------------------------------------------------------------- wrappers ---

def _pcall(kernel, out_shape, *args):
    # Whole-array VMEM blocks (grid=()): every row dim here is <= 90, far below
    # one pipelined block.  At larger batch/signal lengths, tile M (8-multiple
    # rows) and mark it "parallel" (v7x megacore) with vmem_limit_bytes set.
    multi = isinstance(out_shape, (tuple, list))
    return pl.pallas_call(
        kernel,
        out_shape=tuple(out_shape) if multi else out_shape,
        in_specs=[_VMEM_SPEC] * len(args),
        out_specs=tuple([_VMEM_SPEC] * len(out_shape)) if multi else _VMEM_SPEC,
    )(*args)


def im2col_3x3(x, stride):
    """NHWC -> bf16 (B*Ho*Wo, 9*C) patches, tap order (kh, kw, c); padding=1."""
    B, H, W, C = x.shape
    Ho = (H - 1) // stride + 1
    Wo = (W - 1) // stride + 1
    xp = jnp.pad(x, ((0, 0), (1, 1), (1, 1), (0, 0)))
    taps = [xp[:, kh:kh + stride * (Ho - 1) + 1:stride,
               kw:kw + stride * (Wo - 1) + 1:stride, :]
            for kh in range(3) for kw in range(3)]
    cols = jnp.concatenate(taps, axis=-1)                 # (B, Ho, Wo, 9*C)
    return cols.reshape(B * Ho * Wo, 9 * C).astype(jnp.bfloat16), (B, Ho, Wo)


def maxpool_3x3_s2(x):
    """nn.MaxPool2d(3, stride=2, padding=1) on NHWC; single fused XLA pass."""
    B, H, W, C = x.shape
    Ho = (H - 1) // 2 + 1
    Wo = (W - 1) // 2 + 1
    xp = jnp.pad(x, ((0, 0), (1, 1), (1, 1), (0, 0)), constant_values=-jnp.inf)
    out = None
    for kh in range(3):
        for kw in range(3):
            tap = xp[:, kh:kh + 2 * (Ho - 1) + 1:2, kw:kw + 2 * (Wo - 1) + 1:2, :]
            out = tap if out is None else jnp.maximum(out, tap)
    return out


# ----------------------------------------------------- one-time weight pack ---

def _round_up(n, m=_LANE):
    return ((n + m - 1) // m) * m


def _fold_bn(conv_bias, bn):
    """conv-bias + eval-mode BatchNorm -> per-channel (scale, shift)."""
    gamma, beta, mean, var = bn
    scale = gamma / jnp.sqrt(var + _EPS)
    shift = beta + (conv_bias - mean) * scale
    return scale, shift


def _w_mat(w):
    """PyTorch conv weight (Cout, Cin, 3, 3) -> (9*Cin, Cout), (kh, kw, c) rows."""
    return jnp.transpose(w, (2, 3, 1, 0)).reshape(-1, w.shape[0])


def _pad_cols(a, n):
    return a if a.shape[-1] == n else jnp.pad(a, ((0, 0), (0, n - a.shape[-1])))


def _pad_rows(a, n):
    return a if a.shape[0] == n else jnp.pad(a, ((0, n - a.shape[0]), (0, 0)))


def _eff_taps(wm, cin, hi, wi):
    """Effective weight of a 3x3/s2/p1 conv whose output is 1x1 (input hi,wi<=2).

    Valid taps: kh in 1..hi, kw in 1..wi reading input pixel (kh-1, kw-1); rows
    are returned in the same (h, w, c) order as x.reshape(B, hi*wi*cin)."""
    rows = [wm[((dh + 1) * 3 + (dw + 1)) * cin:((dh + 1) * 3 + (dw + 2)) * cin]
            for dh in range(hi) for dw in range(wi)]
    return jnp.concatenate(rows, axis=0)


def pack_params(params, fft, steps, in_len):
    """One-time pack: BN folded, [w1|wd] concatenated, N padded to 128-lane
    multiples, bf16 MXU operands, tap-selected tail weights.  Returns
    (packed arrays pytree, meta dict of static Python ints for slicing)."""
    hop = fft // steps
    h_sp, w_sp = fft // 2 + 1, in_len // hop + 1

    def half(n):                       # 3x3 / stride-2 / pad-1 output size
        return (n - 1) // 2 + 1

    blocks, tail_blocks, couts = [], [], []
    in_tail, prev_pad = False, None
    for p in params["blocks"]:
        w1c, b1 = p["conv1"]
        w2c, b2 = p["conv2"]
        wdc, bd = p["convd"]
        cout, cin = w1c.shape[0], w1c.shape[1]
        cn = _round_up(cout)
        s1, t1 = _fold_bn(b1, p["bn1"])
        s2, t2 = _fold_bn(b2, p["bn2"])
        sd, td = _fold_bn(bd, p["bnd"])
        w1m = _w_mat(w1c) * s1[None, :]
        w2m = _w_mat(w2c) * s2[None, :]
        wdm = _w_mat(wdc) * sd[None, :]
        sf = jnp.concatenate([_pad_cols(t1[None, :], cn),
                              _pad_cols(td[None, :], cn)], axis=1)
        s2p = _pad_cols(t2[None, :], cn)

        if not in_tail and h_sp <= 2 and w_sp <= 2:
            in_tail = True             # conv output is 1x1 from here on
        if in_tail:
            if prev_pad is None:       # first tail block: exact (h, w, c) taps
                w1e = _eff_taps(w1m, cin, h_sp, w_sp)
                wde = _eff_taps(wdm, cin, h_sp, w_sp)
            else:                      # 1x1 input: centre tap, K padded to prev Cn
                w1e = _pad_rows(w1m[4 * cin:5 * cin], prev_pad)
                wde = _pad_rows(wdm[4 * cin:5 * cin], prev_pad)
            w2e = _pad_rows(w2m[4 * cout:5 * cout], cn)
            tail_blocks.append(dict(
                wf=jnp.concatenate([_pad_cols(w1e, cn), _pad_cols(wde, cn)],
                                   axis=1).astype(jnp.bfloat16),
                sf=sf,
                w2=_pad_cols(w2e, cn).astype(jnp.bfloat16),
                s2=s2p))
            prev_pad = cn
            h_sp = w_sp = 1
        else:
            blocks.append(dict(
                wf=jnp.concatenate([_pad_cols(w1m, cn), _pad_cols(wdm, cn)],
                                   axis=1).astype(jnp.bfloat16),
                sf=sf,
                w2=_pad_cols(w2m, cn).astype(jnp.bfloat16),
                s2=s2p))
            couts.append(cout)
            h_sp, w_sp = half(half(h_sp)), half(half(w_sp))
    assert h_sp == 1 and w_sp == 1, "spatial dims must reach 1x1 before classifier"

    w, b = params["classifier"]
    ncls = w.shape[0]
    k_in = prev_pad if prev_pad is not None else w.shape[1]
    nc_pad = _round_up(ncls)
    cls_w = _pad_cols(_pad_rows(w.T, k_in), nc_pad).astype(jnp.bfloat16)
    cls_b = _pad_cols(b[None, :], nc_pad)

    # |STFT| DFT matrices: 1/sqrt(n_fft) folded in, N padded to a 128 multiple.
    f_bins = fft // 2 + 1
    n = jnp.arange(fft, dtype=jnp.float32)[:, None]
    f = jnp.arange(f_bins, dtype=jnp.float32)[None, :]
    ang = 2.0 * math.pi * n * f / fft
    norm = 1.0 / math.sqrt(fft)
    packed = dict(
        blocks=blocks,
        tail=dict(blocks=tail_blocks, cls_w=cls_w, cls_b=cls_b),
        dft_cos=_pad_cols(jnp.cos(ang) * norm, _round_up(f_bins)).astype(jnp.bfloat16),
        dft_sin=_pad_cols(jnp.sin(ang) * norm, _round_up(f_bins)).astype(jnp.bfloat16))
    meta = dict(block_cout=couts, n_classes=ncls)
    return packed, meta


# -------------------------------------------------------------- the model ---

def stft_features(x, dft_cos, dft_sin, n_fft, hop):
    """torch.stft semantics (rect window, center=True reflect pad, normalized,
    onesided) + abs; returns NHWC features (B, F, T, C)."""
    B, C, L = x.shape
    F = n_fft // 2 + 1
    T = L // hop + 1
    xp = jnp.pad(x, ((0, 0), (0, 0), (n_fft // 2, n_fft // 2)), mode="reflect")
    idx = jnp.arange(T)[:, None] * hop + jnp.arange(n_fft)[None, :]
    # TODO(synk): for long signals extract frames in-kernel (pl.ds strided reads).
    frames = xp[:, :, idx].reshape(B * C * T, n_fft).astype(jnp.bfloat16)
    mag = _pcall(_stft_mag_kernel,
                 jax.ShapeDtypeStruct((B * C * T, dft_cos.shape[1]), jnp.float32),
                 frames, dft_cos, dft_sin)
    mag = mag[:, :F]
    return jnp.transpose(mag.reshape(B, C, T, F), (0, 3, 2, 1))


def resblock(x, bp, cout):
    """ResBlock(stride=2, downsample=True, pooling=True), eval-mode semantics."""
    cols_x, (B, Ho, Wo) = im2col_3x3(x, 2)
    M = B * Ho * Wo
    cn = bp["s2"].shape[1]

    # FRONT: one matmul for conv1 + downsample conv (shared A, [w1|wd] RHS).
    h, res = _pcall(
        _block_front_kernel,
        (jax.ShapeDtypeStruct((M, cn), jnp.bfloat16),
         jax.ShapeDtypeStruct((M, cn), jnp.float32)),
        cols_x, bp["wf"], bp["sf"])

    # BACK: conv2 + bn2 shift + residual add fused.
    # TODO(synk): at realistic shapes replace this cols_h round trip with an
    # in-kernel implicit GEMM over row-shifted h (pl.ds / pltpu.roll).
    cols_h, _ = im2col_3x3(h[:, :cout].reshape(B, Ho, Wo, cout), 1)
    out = _pcall(_block_back_kernel,
                 jax.ShapeDtypeStruct((M, cn), jnp.float32),
                 cols_h, bp["w2"], bp["s2"], res)

    out = out[:, :cout].reshape(B, Ho, Wo, cout)
    # maxpool(3, stride=2, pad=1); Dropout(0.5) is identity in eval mode.
    # TODO(synk): training-mode Dropout / BatchNorm batch statistics not implemented.
    return maxpool_3x3_s2(out)


def contrawr_forward(x, packed, *, meta, fft, steps):
    hop = fft // steps
    h = stft_features(x, packed["dft_cos"], packed["dft_sin"], fft, hop)
    for bp, cout in zip(packed["blocks"], meta["block_cout"]):
        h = resblock(h, bp, cout)

    # Fused tail: remaining 1x1-spatial ResBlocks + ELU + classifier, 1 launch.
    B = h.shape[0]
    x_tail = h.reshape(B, -1).astype(jnp.bfloat16)
    tail = packed["tail"]
    n_tail = len(tail["blocks"])
    k_expected = (tail["blocks"][0]["wf"].shape[0] if n_tail
                  else tail["cls_w"].shape[0])
    assert x_tail.shape[1] == k_expected, "tail input width mismatch"
    args = [x_tail]
    for t in tail["blocks"]:
        args += [t["wf"], t["sf"], t["w2"], t["s2"]]
    args += [tail["cls_w"], tail["cls_b"]]
    logits = _pcall(functools.partial(_tail_kernel, n_blocks=n_tail),
                    jax.ShapeDtypeStruct((B, tail["cls_w"].shape[1]), jnp.float32),
                    *args)
    return logits[:, :meta["n_classes"]]


# ------------------------------------------------- deterministic parameters ---

def _conv_init(key, cin, cout):
    kw, kb = jax.random.split(key)
    w = jax.random.normal(kw, (cout, cin, 3, 3), jnp.float32) / math.sqrt(cin * 9)
    b = 0.05 * jax.random.normal(kb, (cout,), jnp.float32)
    return w, b


def _bn_init(key, c):
    k1, k2, k3, k4 = jax.random.split(key, 4)
    gamma = 1.0 + 0.1 * jax.random.normal(k1, (c,), jnp.float32)
    beta = 0.1 * jax.random.normal(k2, (c,), jnp.float32)
    mean = 0.1 * jax.random.normal(k3, (c,), jnp.float32)
    var = jax.random.uniform(k4, (c,), jnp.float32, minval=0.5, maxval=1.5)
    return gamma, beta, mean, var


def init_params(key, in_channels, n_classes):
    dims = [(in_channels, 32), (32, 64), (64, 128), (128, 256)]
    blocks = []
    for (cin, cout) in dims:
        key, k1, k2, k3, k4, k5, k6 = jax.random.split(key, 7)
        blocks.append(dict(
            conv1=_conv_init(k1, cin, cout), bn1=_bn_init(k2, cout),
            conv2=_conv_init(k3, cout, cout), bn2=_bn_init(k4, cout),
            convd=_conv_init(k5, cin, cout), bnd=_bn_init(k6, cout)))
    key, kw, kb = jax.random.split(key, 3)
    w = jax.random.normal(kw, (n_classes, 256), jnp.float32) / math.sqrt(256.0)
    b = 0.05 * jax.random.normal(kb, (n_classes,), jnp.float32)
    return dict(blocks=blocks, classifier=(w, b))


if __name__ == "__main__":
    key = jax.random.PRNGKey(0)
    B, C_IN, L = 2, 4, 64              # raw EEG signal: (batch, channels, time)
    FFT, STEPS, N_CLASSES = 32, 4, 6
    k_x, k_p = jax.random.split(key)
    x = jax.random.normal(k_x, (B, C_IN, L), jnp.float32)
    params = init_params(k_p, C_IN, N_CLASSES)
    packed, meta = pack_params(params, FFT, STEPS, L)   # one-time pack

    fwd = jax.jit(functools.partial(contrawr_forward, meta=meta, fft=FFT, steps=STEPS))
    logits = jax.block_until_ready(fwd(x, packed))

    assert logits.shape == (B, N_CLASSES)
    assert bool(jnp.all(jnp.isfinite(logits)))
    print("KERNEL_OK")
</pallas_src>

<mosaic_0001>
module attributes {stable_mosaic.version = 11 : i64} {
  func.func @_stft_mag_kernel(%arg0: memref<72x32xbf16, #tpu.memory_space<vmem>>, %arg1: memref<32x128xbf16, #tpu.memory_space<vmem>>, %arg2: memref<32x128xbf16, #tpu.memory_space<vmem>>, %arg3: memref<72x128xf32, #tpu.memory_space<vmem>>) attributes {dimension_semantics = [], scalar_prefetch = 0 : i64, scratch_operands = 0 : i64, tpu.core_type = #tpu.core_type<tc>} {
    %c0 = arith.constant 0 : index
    %c0_0 = arith.constant 0 : index
    %0 = vector.load %arg0[%c0, %c0_0] : memref<72x32xbf16, #tpu.memory_space<vmem>>, vector<72x32xbf16>
    %c0_1 = arith.constant 0 : index
    %c0_2 = arith.constant 0 : index
    %1 = vector.load %arg1[%c0_1, %c0_2] : memref<32x128xbf16, #tpu.memory_space<vmem>>, vector<32x128xbf16>
    %cst = arith.constant dense<0.000000e+00> : vector<72x128xf32>
    %2 = tpu.matmul %0, %1, %cst {dimension_numbers = #tpu.dot_dimension_numbers<[1], [0], [0], [1], [0, 0, 1, 1], [], []>} : vector<72x32xbf16>, vector<32x128xbf16>, vector<72x128xf32> -> vector<72x128xf32>
    %c0_3 = arith.constant 0 : index
    %c0_4 = arith.constant 0 : index
    %3 = vector.load %arg2[%c0_3, %c0_4] : memref<32x128xbf16, #tpu.memory_space<vmem>>, vector<32x128xbf16>
    %cst_5 = arith.constant dense<0.000000e+00> : vector<72x128xf32>
    %4 = tpu.matmul %0, %3, %cst_5 {dimension_numbers = #tpu.dot_dimension_numbers<[1], [0], [0], [1], [0, 0, 1, 1], [], []>} : vector<72x32xbf16>, vector<32x128xbf16>, vector<72x128xf32> -> vector<72x128xf32>
    %5 = arith.mulf %2, %2 : vector<72x128xf32>
    %6 = arith.mulf %4, %4 : vector<72x128xf32>
    %7 = arith.addf %5, %6 : vector<72x128xf32>
    %8 = math.sqrt %7 : vector<72x128xf32>
    %c0_6 = arith.constant 0 : index
    %c0_7 = arith.constant 0 : index
    %9 = vector.load %arg3[%c0_6, %c0_7] : memref<72x128xf32, #tpu.memory_space<vmem>>, vector<72x128xf32>
    tpu.vector_store %arg3[%c0_6, %c0_7], %8 {strides = array<i32>} : memref<72x128xf32, #tpu.memory_space<vmem>>, vector<72x128xf32>,
    return
  }
}

module attributes {stable_mosaic.version = 11 : i64} {
  func.func @_block_front_kernel(%arg0: memref<90x36xbf16, #tpu.memory_space<vmem>>, %arg1: memref<36x256xbf16, #tpu.memory_space<vmem>>, %arg2: memref<1x256xf32, #tpu.memory_space<vmem>>, %arg3: memref<90x128xbf16, #tpu.memory_space<vmem>>, %arg4: memref<90x128xf32, #tpu.memory_space<vmem>>) attributes {dimension_semantics = [], scalar_prefetch = 0 : i64, scratch_operands = 0 : i64, tpu.core_type = #tpu.core_type<tc>} {
    %c0 = arith.constant 0 : index
    %c0_0 = arith.constant 0 : index
    %0 = vector.load %arg0[%c0, %c0_0] : memref<90x36xbf16, #tpu.memory_space<vmem>>, vector<90x36xbf16>
    %c0_1 = arith.constant 0 : index
    %c0_2 = arith.constant 0 : index
    %1 = vector.load %arg1[%c0_1, %c0_2] : memref<36x256xbf16, #tpu.memory_space<vmem>>, vector<36x256xbf16>
    %cst = arith.constant dense<0.000000e+00> : vector<90x256xf32>
    %2 = tpu.matmul %0, %1, %cst {dimension_numbers = #tpu.dot_dimension_numbers<[1], [0], [0], [1], [0, 0, 1, 1], [], []>} : vector<90x36xbf16>, vector<36x256xbf16>, vector<90x256xf32> -> vector<90x256xf32>
    %c0_3 = arith.constant 0 : index
    %c0_4 = arith.constant 0 : index
    %3 = vector.load %arg2[%c0_3, %c0_4] : memref<1x256xf32, #tpu.memory_space<vmem>>, vector<1x256xf32>
    %4 = vector.broadcast %3 : vector<1x256xf32> to vector<90x256xf32>
    %5 = arith.addf %2, %4 : vector<90x256xf32>
    %6 = vector.extract_strided_slice %5 {offsets = [0, 0], sizes = [90, 128], strides = [1, 1]} : vector<90x256xf32> to vector<90x128xf32>
    %cst_5 = arith.constant 0.000000e+00 : f32
    %7 = vector.broadcast %cst_5 : f32 to vector<90x128xf32>
    %8 = arith.maximumf %6, %7 : vector<90x128xf32>
    %9 = arith.truncf %8 : vector<90x128xf32> to vector<90x128xbf16>
    %c0_6 = arith.constant 0 : index
    %c0_7 = arith.constant 0 : index
    %10 = vector.load %arg3[%c0_6, %c0_7] : memref<90x128xbf16, #tpu.memory_space<vmem>>, vector<90x128xbf16>
    tpu.vector_store %arg3[%c0_6, %c0_7], %9 {strides = array<i32>} : memref<90x128xbf16, #tpu.memory_space<vmem>>, vector<90x128xbf16>,
    %11 = vector.extract_strided_slice %5 {offsets = [0, 128], sizes = [90, 128], strides = [1, 1]} : vector<90x256xf32> to vector<90x128xf32>
    %c0_8 = arith.constant 0 : index
    %c0_9 = arith.constant 0 : index
    %12 = vector.load %arg4[%c0_8, %c0_9] : memref<90x128xf32, #tpu.memory_space<vmem>>, vector<90x128xf32>
    tpu.vector_store %arg4[%c0_8, %c0_9], %11 {strides = array<i32>} : memref<90x128xf32, #tpu.memory_space<vmem>>, vector<90x128xf32>,
    return
  }
}

module attributes {stable_mosaic.version = 11 : i64} {
  func.func @_block_back_kernel(%arg0: memref<90x288xbf16, #tpu.memory_space<vmem>>, %arg1: memref<288x128xbf16, #tpu.memory_space<vmem>>, %arg2: memref<1x128xf32, #tpu.memory_space<vmem>>, %arg3: memref<90x128xf32, #tpu.memory_space<vmem>>, %arg4: memref<90x128xf32, #tpu.memory_space<vmem>>) attributes {dimension_semantics = [], scalar_prefetch = 0 : i64, scratch_operands = 0 : i64, tpu.core_type = #tpu.core_type<tc>} {
    %c0 = arith.constant 0 : index
    %c0_0 = arith.constant 0 : index
    %0 = vector.load %arg0[%c0, %c0_0] : memref<90x288xbf16, #tpu.memory_space<vmem>>, vector<90x288xbf16>
    %c0_1 = arith.constant 0 : index
    %c0_2 = arith.constant 0 : index
    %1 = vector.load %arg1[%c0_1, %c0_2] : memref<288x128xbf16, #tpu.memory_space<vmem>>, vector<288x128xbf16>
    %cst = arith.constant dense<0.000000e+00> : vector<90x128xf32>
    %2 = tpu.matmul %0, %1, %cst {dimension_numbers = #tpu.dot_dimension_numbers<[1], [0], [0], [1], [0, 0, 1, 1], [], []>} : vector<90x288xbf16>, vector<288x128xbf16>, vector<90x128xf32> -> vector<90x128xf32>
    %c0_3 = arith.constant 0 : index
    %c0_4 = arith.constant 0 : index
    %3 = vector.load %arg2[%c0_3, %c0_4] : memref<1x128xf32, #tpu.memory_space<vmem>>, vector<1x128xf32>
    %4 = vector.broadcast %3 : vector<1x128xf32> to vector<90x128xf32>
    %5 = arith.addf %2, %4 : vector<90x128xf32>
    %c0_5 = arith.constant 0 : index
    %c0_6 = arith.constant 0 : index
    %6 = vector.load %arg3[%c0_5, %c0_6] : memref<90x128xf32, #tpu.memory_space<vmem>>, vector<90x128xf32>
    %7 = arith.addf %5, %6 : vector<90x128xf32>
    %c0_7 = arith.constant 0 : index
    %c0_8 = arith.constant 0 : index
    %8 = vector.load %arg4[%c0_7, %c0_8] : memref<90x128xf32, #tpu.memory_space<vmem>>, vector<90x128xf32>
    tpu.vector_store %arg4[%c0_7, %c0_8], %7 {strides = array<i32>} : memref<90x128xf32, #tpu.memory_space<vmem>>, vector<90x128xf32>,
    return
  }
}

module attributes {stable_mosaic.version = 11 : i64} {
  func.func @_block_front_kernel(%arg0: memref<12x288xbf16, #tpu.memory_space<vmem>>, %arg1: memref<288x256xbf16, #tpu.memory_space<vmem>>, %arg2: memref<1x256xf32, #tpu.memory_space<vmem>>, %arg3: memref<12x128xbf16, #tpu.memory_space<vmem>>, %arg4: memref<12x128xf32, #tpu.memory_space<vmem>>) attributes {dimension_semantics = [], scalar_prefetch = 0 : i64, scratch_operands = 0 : i64, tpu.core_type = #tpu.core_type<tc>} {
    %c0 = arith.constant 0 : index
    %c0_0 = arith.constant 0 : index
    %0 = vector.load %arg0[%c0, %c0_0] : memref<12x288xbf16, #tpu.memory_space<vmem>>, vector<12x288xbf16>
    %c0_1 = arith.constant 0 : index
    %c0_2 = arith.constant 0 : index
    %1 = vector.load %arg1[%c0_1, %c0_2] : memref<288x256xbf16, #tpu.memory_space<vmem>>, vector<288x256xbf16>
    %cst = arith.constant dense<0.000000e+00> : vector<12x256xf32>
    %2 = tpu.matmul %0, %1, %cst {dimension_numbers = #tpu.dot_dimension_numbers<[1], [0], [0], [1], [0, 0, 1, 1], [], []>} : vector<12x288xbf16>, vector<288x256xbf16>, vector<12x256xf32> -> vector<12x256xf32>
    %c0_3 = arith.constant 0 : index
    %c0_4 = arith.constant 0 : index
    %3 = vector.load %arg2[%c0_3, %c0_4] : memref<1x256xf32, #tpu.memory_space<vmem>>, vector<1x256xf32>
    %4 = vector.broadcast %3 : vector<1x256xf32> to vector<12x256xf32>
    %5 = arith.addf %2, %4 : vector<12x256xf32>
    %6 = vector.extract_strided_slice %5 {offsets = [0, 0], sizes = [12, 128], strides = [1, 1]} : vector<12x256xf32> to vector<12x128xf32>
    %cst_5 = arith.constant 0.000000e+00 : f32
    %7 = vector.broadcast %cst_5 : f32 to vector<12x128xf32>
    %8 = arith.maximumf %6, %7 : vector<12x128xf32>
    %9 = arith.truncf %8 : vector<12x128xf32> to vector<12x128xbf16>
    %c0_6 = arith.constant 0 : index
    %c0_7 = arith.constant 0 : index
    %10 = vector.load %arg3[%c0_6, %c0_7] : memref<12x128xbf16, #tpu.memory_space<vmem>>, vector<12x128xbf16>
    tpu.vector_store %arg3[%c0_6, %c0_7], %9 {strides = array<i32>} : memref<12x128xbf16, #tpu.memory_space<vmem>>, vector<12x128xbf16>,
    %11 = vector.extract_strided_slice %5 {offsets = [0, 128], sizes = [12, 128], strides = [1, 1]} : vector<12x256xf32> to vector<12x128xf32>
    %c0_8 = arith.constant 0 : index
    %c0_9 = arith.constant 0 : index
    %12 = vector.load %arg4[%c0_8, %c0_9] : memref<12x128xf32, #tpu.memory_space<vmem>>, vector<12x128xf32>
    tpu.vector_store %arg4[%c0_8, %c0_9], %11 {strides = array<i32>} : memref<12x128xf32, #tpu.memory_space<vmem>>, vector<12x128xf32>,
    return
  }
}

module attributes {stable_mosaic.version = 11 : i64} {
  func.func @_block_back_kernel(%arg0: memref<12x576xbf16, #tpu.memory_space<vmem>>, %arg1: memref<576x128xbf16, #tpu.memory_space<vmem>>, %arg2: memref<1x128xf32, #tpu.memory_space<vmem>>, %arg3: memref<12x128xf32, #tpu.memory_space<vmem>>, %arg4: memref<12x128xf32, #tpu.memory_space<vmem>>) attributes {dimension_semantics = [], scalar_prefetch = 0 : i64, scratch_operands = 0 : i64, tpu.core_type = #tpu.core_type<tc>} {
    %c0 = arith.constant 0 : index
    %c0_0 = arith.constant 0 : index
    %0 = vector.load %arg0[%c0, %c0_0] : memref<12x576xbf16, #tpu.memory_space<vmem>>, vector<12x576xbf16>
    %c0_1 = arith.constant 0 : index
    %c0_2 = arith.constant 0 : index
    %1 = vector.load %arg1[%c0_1, %c0_2] : memref<576x128xbf16, #tpu.memory_space<vmem>>, vector<576x128xbf16>
    %cst = arith.constant dense<0.000000e+00> : vector<12x128xf32>
    %2 = tpu.matmul %0, %1, %cst {dimension_numbers = #tpu.dot_dimension_numbers<[1], [0], [0], [1], [0, 0, 1, 1], [], []>} : vector<12x576xbf16>, vector<576x128xbf16>, vector<12x128xf32> -> vector<12x128xf32>
    %c0_3 = arith.constant 0 : index
    %c0_4 = arith.constant 0 : index
    %3 = vector.load %arg2[%c0_3, %c0_4] : memref<1x128xf32, #tpu.memory_space<vmem>>, vector<1x128xf32>
    %4 = vector.broadcast %3 : vector<1x128xf32> to vector<12x128xf32>
    %5 = arith.addf %2, %4 : vector<12x128xf32>
    %c0_5 = arith.constant 0 : index
    %c0_6 = arith.constant 0 : index
    %6 = vector.load %arg3[%c0_5, %c0_6] : memref<12x128xf32, #tpu.memory_space<vmem>>, vector<12x128xf32>
    %7 = arith.addf %5, %6 : vector<12x128xf32>
    %c0_7 = arith.constant 0 : index
    %c0_8 = arith.constant 0 : index
    %8 = vector.load %arg4[%c0_7, %c0_8] : memref<12x128xf32, #tpu.memory_space<vmem>>, vector<12x128xf32>
    tpu.vector_store %arg4[%c0_7, %c0_8], %7 {strides = array<i32>} : memref<12x128xf32, #tpu.memory_space<vmem>>, vector<12x128xf32>,
    return
  }
}

module attributes {stable_mosaic.version = 11 : i64} {
  func.func @_tail_kernel(%arg0: memref<2x128xbf16, #tpu.memory_space<vmem>>, %arg1: memref<128x256xbf16, #tpu.memory_space<vmem>>, %arg2: memref<1x256xf32, #tpu.memory_space<vmem>>, %arg3: memref<128x128xbf16, #tpu.memory_space<vmem>>, %arg4: memref<1x128xf32, #tpu.memory_space<vmem>>, %arg5: memref<128x512xbf16, #tpu.memory_space<vmem>>, %arg6: memref<1x512xf32, #tpu.memory_space<vmem>>, %arg7: memref<256x256xbf16, #tpu.memory_space<vmem>>, %arg8: memref<1x256xf32, #tpu.memory_space<vmem>>, %arg9: memref<256x128xbf16, #tpu.memory_space<vmem>>, %arg10: memref<1x128xf32, #tpu.memory_space<vmem>>, %arg11: memref<2x128xf32, #tpu.memory_space<vmem>>) attributes {dimension_semantics = [], scalar_prefetch = 0 : i64, scratch_operands = 0 : i64, tpu.core_type = #tpu.core_type<tc>} {
    %c0 = arith.constant 0 : index
    %c0_0 = arith.constant 0 : index
    %0 = vector.load %arg0[%c0, %c0_0] : memref<2x128xbf16, #tpu.memory_space<vmem>>, vector<2x128xbf16>
    %c0_1 = arith.constant 0 : index
    %c0_2 = arith.constant 0 : index
    %1 = vector.load %arg1[%c0_1, %c0_2] : memref<128x256xbf16, #tpu.memory_space<vmem>>, vector<128x256xbf16>
    %cst = arith.constant dense<0.000000e+00> : vector<2x256xf32>
    %2 = tpu.matmul %0, %1, %cst {dimension_numbers = #tpu.dot_dimension_numbers<[1], [0], [0], [1], [0, 0, 1, 1], [], []>} : vector<2x128xbf16>, vector<128x256xbf16>, vector<2x256xf32> -> vector<2x256xf32>
    %c0_3 = arith.constant 0 : index
    %c0_4 = arith.constant 0 : index
    %3 = vector.load %arg2[%c0_3, %c0_4] : memref<1x256xf32, #tpu.memory_space<vmem>>, vector<1x256xf32>
    %4 = vector.broadcast %3 : vector<1x256xf32> to vector<2x256xf32>
    %5 = arith.addf %2, %4 : vector<2x256xf32>
    %6 = vector.extract_strided_slice %5 {offsets = [0, 0], sizes = [2, 128], strides = [1, 1]} : vector<2x256xf32> to vector<2x128xf32>
    %cst_5 = arith.constant 0.000000e+00 : f32
    %7 = vector.broadcast %cst_5 : f32 to vector<2x128xf32>
    %8 = arith.maximumf %6, %7 : vector<2x128xf32>
    %9 = arith.truncf %8 : vector<2x128xf32> to vector<2x128xbf16>
    %c0_6 = arith.constant 0 : index
    %c0_7 = arith.constant 0 : index
    %10 = vector.load %arg3[%c0_6, %c0_7] : memref<128x128xbf16, #tpu.memory_space<vmem>>, vector<128x128xbf16>
    %cst_8 = arith.constant dense<0.000000e+00> : vector<2x128xf32>
    %11 = tpu.matmul %9, %10, %cst_8 {dimension_numbers = #tpu.dot_dimension_numbers<[1], [0], [0], [1], [0, 0, 1, 1], [], []>} : vector<2x128xbf16>, vector<128x128xbf16>, vector<2x128xf32> -> vector<2x128xf32>
    %c0_9 = arith.constant 0 : index
    %c0_10 = arith.constant 0 : index
    %12 = vector.load %arg4[%c0_9, %c0_10] : memref<1x128xf32, #tpu.memory_space<vmem>>, vector<1x128xf32>
    %13 = vector.broadcast %12 : vector<1x128xf32> to vector<2x128xf32>
    %14 = arith.addf %11, %13 : vector<2x128xf32>
    %15 = vector.extract_strided_slice %5 {offsets = [0, 128], sizes = [2, 128], strides = [1, 1]} : vector<2x256xf32> to vector<2x128xf32>
    %16 = arith.addf %14, %15 : vector<2x128xf32>
    %17 = arith.truncf %16 : vector<2x128xf32> to vector<2x128xbf16>
    %c0_11 = arith.constant 0 : index
    %c0_12 = arith.constant 0 : index
    %18 = vector.load %arg5[%c0_11, %c0_12] : memref<128x512xbf16, #tpu.memory_space<vmem>>, vector<128x512xbf16>
    %cst_13 = arith.constant dense<0.000000e+00> : vector<2x512xf32>
    %19 = tpu.matmul %17, %18, %cst_13 {dimension_numbers = #tpu.dot_dimension_numbers<[1], [0], [0], [1], [0, 0, 1, 1], [], []>} : vector<2x128xbf16>, vector<128x512xbf16>, vector<2x512xf32> -> vector<2x512xf32>
    %c0_14 = arith.constant 0 : index
    %c0_15 = arith.constant 0 : index
    %20 = vector.load %arg6[%c0_14, %c0_15] : memref<1x512xf32, #tpu.memory_space<vmem>>, vector<1x512xf32>
    %21 = vector.broadcast %20 : vector<1x512xf32> to vector<2x512xf32>
    %22 = arith.addf %19, %21 : vector<2x512xf32>
    %23 = vector.extract_strided_slice %22 {offsets = [0, 0], sizes = [2, 256], strides = [1, 1]} : vector<2x512xf32> to vector<2x256xf32>
    %cst_16 = arith.constant 0.000000e+00 : f32
    %24 = vector.broadcast %cst_16 : f32 to vector<2x256xf32>
    %25 = arith.maximumf %23, %24 : vector<2x256xf32>
    %26 = arith.truncf %25 : vector<2x256xf32> to vector<2x256xbf16>
    %c0_17 = arith.constant 0 : index
    %c0_18 = arith.constant 0 : index
    %27 = vector.load %arg7[%c0_17, %c0_18] : memref<256x256xbf16, #tpu.memory_space<vmem>>, vector<256x256xbf16>
    %cst_19 = arith.constant dense<0.000000e+00> : vector<2x256xf32>
    %28 = tpu.matmul %26, %27, %cst_19 {dimension_numbers = #tpu.dot_dimension_numbers<[1], [0], [0], [1], [0, 0, 1, 1], [], []>} : vector<2x256xbf16>, vector<256x256xbf16>, vector<2x256xf32> -> vector<2x256xf32>
    %c0_20 = arith.constant 0 : index
    %c0_21 = arith.constant 0 : index
    %29 = vector.load %arg8[%c0_20, %c0_21] : memref<1x256xf32, #tpu.memory_space<vmem>>, vector<1x256xf32>
    %30 = vector.broadcast %29 : vector<1x256xf32> to vector<2x256xf32>
    %31 = arith.addf %28, %30 : vector<2x256xf32>
    %32 = vector.extract_strided_slice %22 {offsets = [0, 256], sizes = [2, 256], strides = [1, 1]} : vector<2x512xf32> to vector<2x256xf32>
    %33 = arith.addf %31, %32 : vector<2x256xf32>
    %cst_22 = arith.constant 0.000000e+00 : f32
    %34 = vector.broadcast %cst_22 : f32 to vector<2x256xf32>
    %35 = arith.cmpf ogt, %33, %34 : vector<2x256xf32>
    %cst_23 = arith.constant 0.000000e+00 : f32
    %36 = vector.broadcast %cst_23 : f32 to vector<2x256xf32>
    %37 = arith.minimumf %33, %36 : vector<2x256xf32>
    %38 = math.exp %37 : vector<2x256xf32>
    %cst_24 = arith.constant 1.000000e+00 : f32
    %39 = vector.broadcast %cst_24 : f32 to vector<2x256xf32>
    %40 = arith.subf %38, %39 : vector<2x256xf32>
    %41 = arith.select %35, %33, %40 : vector<2x256xi1>, vector<2x256xf32>
    %42 = arith.truncf %41 : vector<2x256xf32> to vector<2x256xbf16>
    %c0_25 = arith.constant 0 : index
    %c0_26 = arith.constant 0 : index
    %43 = vector.load %arg9[%c0_25, %c0_26] : memref<256x128xbf16, #tpu.memory_space<vmem>>, vector<256x128xbf16>
    %cst_27 = arith.constant dense<0.000000e+00> : vector<2x128xf32>
    %44 = tpu.matmul %42, %43, %cst_27 {dimension_numbers = #tpu.dot_dimension_numbers<[1], [0], [0], [1], [0, 0, 1, 1], [], []>} : vector<2x256xbf16>, vector<256x128xbf16>, vector<2x128xf32> -> vector<2x128xf32>
    %c0_28 = arith.constant 0 : index
    %c0_29 = arith.constant 0 : index
    %45 = vector.load %arg10[%c0_28, %c0_29] : memref<1x128xf32, #tpu.memory_space<vmem>>, vector<1x128xf32>
    %46 = vector.broadcast %45 : vector<1x128xf32> to vector<2x128xf32>
    %47 = arith.addf %44, %46 : vector<2x128xf32>
    %c0_30 = arith.constant 0 : index
    %c0_31 = arith.constant 0 : index
    %48 = vector.load %arg11[%c0_30, %c0_31] : memref<2x128xf32, #tpu.memory_space<vmem>>, vector<2x128xf32>
    tpu.vector_store %arg11[%c0_30, %c0_31], %47 {strides = array<i32>} : memref<2x128xf32, #tpu.memory_space<vmem>>, vector<2x128xf32>,
    return
  }
}

</mosaic_0001>

<bundles_post_ra>
// kernel: contrawr_forward.6
= control target key start
LH: loop header
LB: loop body
LE: loop exit
PB: predicated region body
PF: predicated region fallthrough
CT: control target
= control target key end

     0   :  { %v452_v0 = vmov 0.0   ;;  %vm453_vm0 = vmmov 0   ;;  %vm63_vm1 = vcmask 261120   ;;  %s572_s1 = inlined_call_operand.vmem [shape: bf16[32,128], index: 1, kind: input, shape index: {}]   ;;  %s573_s2 = inlined_call_operand.vmem [shape: bf16[32,128], index: 2, kind: input, shape index: {}]   ;;  %s574_s0 = inlined_call_operand.vmem [shape: bf16[72,32], index: 0, kind: input, shape index: {}]   ;;  %s575_s3 = inlined_call_operand.vmem [shape: f32[72,128], index: 3, kind: output, shape index: {}]  }
   0x1   :  { %375 = vmatprep.subr.bf16.mxu0 %v452_v0  ;;  %399 = vmatprep.subr.bf16.mxu1 %v452_v0  ;;  %v425_v1 = vld [vmem:[%s572_s1] sm:$0xff]   ;;  %v427_v3 = vld [vmem:[%s572_s1 + $0x8] sm:$0xff]   ;;  %v431_v7 = vld [vmem:[%s574_s0 + $0x10] sm:$0xff]  }
   0x2   :  { %v426_v2 = vld [vmem:[%s573_s2] sm:$0xff]   ;;  %379 = vmatprep.mubr.msk.bf16.mxu0 %vm453_vm0, %v452_v0  ;;  %403 = vmatprep.mubr.msk.bf16.mxu1 %vm453_vm0, %v452_v0  ;;  %v428_v4 = vld [vmem:[%s573_s2 + $0x8] sm:$0xff]   ;;  %v432_v8 = vld [vmem:[%s574_s0 + $0x18] sm:$0xff]  }
   0x3   :  { %376 = vmatpush3.bf16.msra.mxu0 %v425_v1  ;;  %400 = vmatpush3.bf16.msra.mxu1 %v426_v2  ;;  %v429_v5 = vld [vmem:[%s574_s0] sm:$0xff]   ;;  %v430_v6 = vld [vmem:[%s574_s0 + $0x8] sm:$0xff]  }
   0x4   :  { %377 = vmatprep.subr.bf16.mxu0 %v452_v0  ;;  %401 = vmatprep.subr.bf16.mxu1 %v452_v0  ;;  %v433_v9 = vld [vmem:[%s574_s0 + $0x20] ss:$0 sps:$4 sm:$0xff]  }
   0x7   :  { %378 = vmatpush3.bf16.msra.mxu0 %v427_v3  ;;  %402 = vmatpush3.bf16.msra.mxu1 %v428_v4 }
   0xa   :  { %380 = vmatmul.mubr.msk.bf16.vlgmr.msra.gmra.mrb[0].mxu0 %vm63_vm1, %v429_v5  ;;  %404 = vmatmul.mubr.msk.bf16.vlgmr.msra.gmra.mrb[0].mxu1 %vm63_vm1, %v429_v5 }
   0xb   :  { %383 = vmatprep.mubr.msk.bf16.mxu0 %vm453_vm0, %v452_v0  ;;  %407 = vmatprep.mubr.msk.bf16.mxu1 %vm453_vm0, %v452_v0 }
  0x12   :  { %384 = vmatmul.mubr.msk.bf16.gmra.mrb[4].mxu0 %vm63_vm1, %v430_v6  ;;  %408 = vmatmul.mubr.msk.bf16.gmra.mrb[4].mxu1 %vm63_vm1, %v430_v6 }
  0x13   :  { %387 = vmatprep.mubr.msk.bf16.mxu0 %vm453_vm0, %v452_v0  ;;  %411 = vmatprep.mubr.msk.bf16.mxu1 %vm453_vm0, %v452_v0 }
  0x1a   :  { %388 = vmatmul.mubr.msk.bf16.gmra.mrb[8].mxu0 %vm63_vm1, %v431_v7  ;;  %412 = vmatmul.mubr.msk.bf16.gmra.mrb[8].mxu1 %vm63_vm1, %v431_v7 }
  0x1b   :  { %391 = vmatprep.mubr.msk.bf16.mxu0 %vm453_vm0, %v452_v0  ;;  %415 = vmatprep.mubr.msk.bf16.mxu1 %vm453_vm0, %v452_v0 }
  0x22   :  { %392 = vmatmul.mubr.msk.bf16.gmra.mrb[12].mxu0 %vm63_vm1, %v432_v8  ;;  %416 = vmatmul.mubr.msk.bf16.gmra.mrb[12].mxu1 %vm63_vm1, %v432_v8 }
  0x23   :  { %395 = vmatprep.mubr.msk.bf16.mxu0 %vm453_vm0, %v452_v0  ;;  %419 = vmatprep.mubr.msk.bf16.mxu1 %vm453_vm0, %v452_v0 }
  0x2a   :  { %396 = vmatmul.mubr.msk.bf16.gmra.mrb[16].mxu0 %vm63_vm1, %v433_v9  ;;  %420 = vmatmul.mubr.msk.bf16.gmra.mrb[16].mxu1 %vm63_vm1, %v433_v9 }
  0xdd   :  { %v113_v10 = vpop.f32.mrb[0].mxu0  ;;  %v201_v12 = vpop.f32.mrb[0].mxu1 }
  0xde   :  { %v239_v11 = vmul.f32 %v113_v10, %v113_v10  ;;  %v381_v13 = vpop.f32.mrb[1].mxu0  ;;  %v248_v14 = vmul.f32 %v201_v12, %v201_v12  ;;  %v405_v15 = vpop.f32.mrb[1].mxu1 }
  0xdf   :  { %v116_v16 = vpop.f32.mrb[2].mxu0  ;;  %v204_v18 = vpop.f32.mrb[2].mxu1 }
  0xe0   :  { %v240_v17 = vmul.f32 %v116_v16, %v116_v16  ;;  %v382_v19 = vpop.f32.mrb[3].mxu0  ;;  %v257_v20 = vadd.f32 %v248_v14, %v239_v11  ;;  %v249_v21 = vmul.f32 %v204_v18, %v204_v18  ;;  %v406_v22 = vpop.f32.mrb[3].mxu1 }
  0xe2   :  { %434 = vrsqrt.f32 %v257_v20  ;;  %v258_v23 = vadd.f32 %v249_v21, %v240_v17  ;;  %vm268_vm2 = vcmp.eq.f32.partialorder %v257_v20, inf  ;;  %v271_v43 = vand.u32 2147483648, %v257_v20 }
  0xe3   :  { %vm270_vm3 = vcmp.eq.f32.partialorder %v257_v20, 0.0 }
  0xe4   :  { %436 = vrsqrt.f32 %v258_v23  ;;  %vm275_vm4 = vcmp.eq.f32.partialorder %v258_v23, inf  ;;  %v278_v58 = vand.u32 2147483648, %v258_v23  ;;  %vm277_vm5 = vcmp.eq.f32.partialorder %v258_v23, 0.0 }
  0xe5   :  { %v121_v24 = vpop.f32.mrb[4].mxu0  ;;  %v209_v25 = vpop.f32.mrb[4].mxu1 }
  0xe6   :  { %v385_v26 = vpop.f32.mrb[5].mxu0  ;;  %v241_v27 = vmul.f32 %v121_v24, %v121_v24  ;;  %v250_v28 = vmul.f32 %v209_v25, %v209_v25  ;;  %v409_v29 = vpop.f32.mrb[5].mxu1 }
  0xe7   :  { %v124_v30 = vpop.f32.mrb[6].mxu0  ;;  %v212_v32 = vpop.f32.mrb[6].mxu1 }
  0xe8   :  { %v242_v31 = vmul.f32 %v124_v30, %v124_v30  ;;  %v386_v33 = vpop.f32.mrb[7].mxu0  ;;  %v259_v34 = vadd.f32 %v250_v28, %v241_v27  ;;  %v251_v35 = vmul.f32 %v212_v32, %v212_v32  ;;  %v410_v36 = vpop.f32.mrb[7].mxu1 }
  0xea   :  { %438 = vrsqrt.f32 %v259_v34  ;;  %v521_v37 = vadd.f32 %v251_v35, %v242_v31  ;;  %vm282_vm6 = vcmp.eq.f32.partialorder %v259_v34, inf  ;;  %v285_v3 = vand.u32 2147483648, %v259_v34 }
  0xeb   :  { %vm284_vm7 = vcmp.eq.f32.partialorder %v259_v34, 0.0 }
  0xec   :  { %v435_v38 = vpop.eup %434  ;;  %440 = vrsqrt.f32 %v521_v37  ;;  %vm289_vm8 = vcmp.eq.f32.partialorder %v521_v37, inf  ;;  %v292_v18 = vand.u32 2147483648, %v521_v37  ;;  %vm291_vm9 = vcmp.eq.f32.partialorder %v521_v37, 0.0 }
  0xed   :  { %v129_v39 = vpop.f32.mrb[8].mxu0  ;;  %v267_v40 = vmul.f32 %v435_v38, %v257_v20  ;;  %v217_v41 = vpop.f32.mrb[8].mxu1 }
  0xee   :  { %v389_v42 = vpop.f32.mrb[9].mxu0  ;;  %v243_v44 = vmul.f32 %v129_v39, %v129_v39  ;;  %v252_v45 = vmul.f32 %v217_v41, %v217_v41  ;;  %v413_v46 = vpop.f32.mrb[9].mxu1 }
  0xef   :  { %v132_v47 = vpop.f32.mrb[10].mxu0  ;;  %v437_v48 = vpop.eup %436  ;;  %v269_v49 = vsel %vm268_vm2, %v257_v20, %v267_v40 }
  0xf0   :  { %v244_v50 = vmul.f32 %v132_v47, %v132_v47  ;;  %v220_v51 = vpop.f32.mrb[10].mxu1  ;;  %v390_v52 = vpop.f32.mrb[11].mxu0  ;;  %v272_v53 = vsel %vm270_vm3, %v271_v43, %v269_v49  ;;  %v274_v54 = vmul.f32 %v437_v48, %v258_v23  ;;  %v524_v55 = vadd.f32 %v252_v45, %v243_v44 }
  0xf1   :  { %v253_v56 = vmul.f32 %v220_v51, %v220_v51  ;;  %v414_v57 = vpop.f32.mrb[11].mxu1  ;;  %329 = vst [vmem:[%s575_s3] sm:$0xff] %v272_v53 }
  0xf2   :  { %v276_v59 = vsel %vm275_vm4, %v258_v23, %v274_v54  ;;  %442 = vrsqrt.f32 %v524_v55  ;;  %vm296_vm10 = vcmp.eq.f32.partialorder %v524_v55, inf  ;;  %v299_v27 = vand.u32 2147483648, %v524_v55 }
  0xf3   :  { %v279_v60 = vsel %vm277_vm5, %v278_v58, %v276_v59  ;;  %v530_v61 = vadd.f32 %v253_v56, %v244_v50  ;;  %vm298_vm11 = vcmp.eq.f32.partialorder %v524_v55, 0.0 }
  0xf4   :  { %v439_v62 = vpop.eup %438  ;;  %330 = vst [vmem:[%s575_s3 + $0x8] sm:$0xff] %v279_v60 }
  0xf5   :  { %v137_v63 = vpop.f32.mrb[12].mxu0  ;;  %v281_v0 = vmul.f32 %v439_v62, %v259_v34  ;;  %444 = vrsqrt.f32 %v530_v61  ;;  %v225_v1 = vpop.f32.mrb[12].mxu1  ;;  %vm303_vm12 = vcmp.eq.f32.partialorder %v530_v61, inf  ;;  %v306_v40 = vand.u32 2147483648, %v530_v61 }
  0xf6   :  { %v393_v2 = vpop.f32.mrb[13].mxu0  ;;  %v245_v4 = vmul.f32 %v137_v63, %v137_v63  ;;  %v254_v5 = vmul.f32 %v225_v1, %v225_v1  ;;  %v417_v6 = vpop.f32.mrb[13].mxu1  ;;  %vm305_vm13 = vcmp.eq.f32.partialorder %v530_v61, 0.0 }
  0xf7   :  { %v140_v7 = vpop.f32.mrb[14].mxu0  ;;  %v441_v8 = vpop.eup %440  ;;  %v283_v9 = vsel %vm282_vm6, %v259_v34, %v281_v0 }
  0xf8   :  { %v246_v10 = vmul.f32 %v140_v7, %v140_v7  ;;  %v228_v11 = vpop.f32.mrb[14].mxu1  ;;  %v394_v12 = vpop.f32.mrb[15].mxu0  ;;  %v286_v13 = vsel %vm284_vm7, %v285_v3, %v283_v9  ;;  %v288_v14 = vmul.f32 %v441_v8, %v521_v37  ;;  %v263_v15 = vadd.f32 %v254_v5, %v245_v4 }
  0xf9   :  { %v255_v16 = vmul.f32 %v228_v11, %v228_v11  ;;  %v418_v17 = vpop.f32.mrb[15].mxu1  ;;  %331 = vst [vmem:[%s575_s3 + $0x10] sm:$0xff] %v286_v13 }
  0xfa   :  { %v290_v19 = vsel %vm289_vm8, %v521_v37, %v288_v14  ;;  %446 = vrsqrt.f32 %v263_v15  ;;  %vm310_vm14 = vcmp.eq.f32.partialorder %v263_v15, inf  ;;  %v313_v45 = vand.u32 2147483648, %v263_v15 }
  0xfb   :  { %v293_v20 = vsel %vm291_vm9, %v292_v18, %v290_v19  ;;  %v264_v21 = vadd.f32 %v255_v16, %v246_v10  ;;  %vm312_vm15 = vcmp.eq.f32.partialorder %v263_v15, 0.0 }
  0xfc   :  { %v443_v22 = vpop.eup %442  ;;  %332 = vst [vmem:[%s575_s3 + $0x18] sm:$0xff] %v293_v20 }
  0xfd   :  { %v145_v23 = vpop.f32.mrb[16].mxu0  ;;  %v295_v24 = vmul.f32 %v443_v22, %v524_v55  ;;  %448 = vrsqrt.f32 %v264_v21  ;;  %v233_v25 = vpop.f32.mrb[16].mxu1  ;;  %vm317_vm0 = vcmp.eq.f32.partialorder %v264_v21, inf  ;;  %v320_v50 = vand.u32 2147483648, %v264_v21 }
  0xfe   :  { %v397_v26 = vpop.f32.mrb[17].mxu0  ;;  %v247_v28 = vmul.f32 %v145_v23, %v145_v23  ;;  %v256_v29 = vmul.f32 %v233_v25, %v233_v25  ;;  %v421_v30 = vpop.f32.mrb[17].mxu1  ;;  %vm319_vm1 = vcmp.eq.f32.partialorder %v264_v21, 0.0 }
  0xff   :  { %v148_v31 = vpop.f32.mrb[18].mxu0  ;;  %v445_v32 = vpop.eup %444  ;;  %v297_v33 = vsel %vm296_vm10, %v524_v55, %v295_v24 }
 0x100   :  { %v236_v34 = vpop.f32.mrb[18].mxu1  ;;  %v398_v35 = vpop.f32.mrb[19].mxu0  ;;  %v300_v36 = vsel %vm298_vm11, %v299_v27, %v297_v33  ;;  %v302_v37 = vmul.f32 %v445_v32, %v530_v61  ;;  %v265_v38 = vadd.f32 %v256_v29, %v247_v28 }
 0x101   :  { %v422_v39 = vpop.f32.mrb[19].mxu1  ;;  %333 = vst [vmem:[%s575_s3 + $0x20] sm:$0xff] %v300_v36 }
 0x102   :  { %v304_v41 = vsel %vm303_vm12, %v530_v61, %v302_v37  ;;  %450 = vrsqrt.f32 %v265_v38  ;;  %vm324_vm2 = vcmp.eq.f32.partialorder %v265_v38, inf  ;;  %v327_v55 = vand.u32 2147483648, %v265_v38 }
 0x103   :  { %v307_v42 = vsel %vm305_vm13, %v306_v40, %v304_v41  ;;  %vm326_vm3 = vcmp.eq.f32.partialorder %v265_v38, 0.0 }
 0x104   :  { %v447_v43 = vpop.eup %446  ;;  %334 = vst [vmem:[%s575_s3 + $0x28] sm:$0xff] %v307_v42 }
 0x105   :  { %v309_v44 = vmul.f32 %v447_v43, %v263_v15 }
 0x107   :  { %v449_v46 = vpop.eup %448  ;;  %v311_v47 = vsel %vm310_vm14, %v263_v15, %v309_v44 }
 0x108   :  { %v314_v48 = vsel %vm312_vm15, %v313_v45, %v311_v47  ;;  %v316_v49 = vmul.f32 %v449_v46, %v264_v21 }
 0x109   :  { %335 = vst [vmem:[%s575_s3 + $0x30] sm:$0xff] %v314_v48 }
 0x10a   :  { %v318_v51 = vsel %vm317_vm0, %v264_v21, %v316_v49 }
 0x10b   :  { %v321_v52 = vsel %vm319_vm1, %v320_v50, %v318_v51 }
 0x10c   :  { %v451_v53 = vpop.eup %450  ;;  %336 = vst [vmem:[%s575_s3 + $0x38] sm:$0xff] %v321_v52 }
 0x10d   :  { %v323_v54 = vmul.f32 %v451_v53, %v265_v38 }
 0x10f   :  { %v325_v56 = vsel %vm324_vm2, %v265_v38, %v323_v54 }
 0x110   :  { %v328_v57 = vsel %vm326_vm3, %v327_v55, %v325_v56 }
 0x111   :  { %337 = vst [vmem:[%s575_s3 + $0x40] sm:$0xff] %v328_v57 }

// kernel: contrawr_forward.7
= control target key start
LH: loop header
LB: loop body
LE: loop exit
PB: predicated region body
PF: predicated region fallthrough
CT: control target
= control target key end

     0   :  { %v405_v1 = vmov 0   ;;  %vm120_vm0 = vcmask 1041408   ;;  %vm101_vm1 = vcmask 293888   ;;  %v36_v15 = vlaneseq  ;;  %s552_s1 = inlined_call_operand.vmem [shape: bf16[36,256], index: 1, kind: input, shape index: {}]   ;;  %s553_s0 = inlined_call_operand.vmem [shape: bf16[90,36], index: 0, kind: input, shape index: {}]   ;;  %s554_s2 = inlined_call_operand.vmem [shape: f32[1,256], index: 2, kind: input, shape index: {}]   ;;  %s555_s4 = inlined_call_operand.vmem [shape: f32[90,128], index: 4, kind: output, shape index: {1}]   ;;  %s556_s3 = inlined_call_operand.vmem [shape: bf16[90,128], index: 3, kind: output, shape index: {0}]  }
   0x1   :  { %v391_v0 = vld [vmem:[%s552_s1 + $0x4] ss:$8 sps:$4 sm:$0xff]   ;;  %159 = vmatprep.mubr.bf16.mxu0 %v405_v1  ;;  %189 = vmatprep.mubr.bf16.mxu1 %v405_v1  ;;  %v393_v2 = vld [vmem:[%s552_s1] ss:$8 sps:$4 sm:$0xff]   ;;  %v394_v3 = vld [vmem:[%s552_s1 + $0x14] ss:$8 sps:$4 sm:$0xff]  }
   0x2   :  { %127 = vmatprep.subr.bf16.mxu0 %v391_v0  ;;  %384 = vmatprep.subr.bf16.mxu1 %v391_v0  ;;  %v33_v4 = vld [vmem:[%s552_s1 + $0x20] sm:$0x33]  ;;  %v396_v5 = vld [vmem:[%s552_s1 + $0x10] ss:$8 sps:$4 sm:$0xff]   ;;  %v401_v11 = vld [vmem:[%s553_s0 + $0x8] sm:$0xff]   ;;  %v37_v16 = vshrl.u32 %v36_v15, 7 }
   0x3   :  { %128 = vmatpush1.bf16.msra.mxu0 %v393_v2  ;;  %387 = vmatpush1.bf16.msra.mxu1 %v393_v2  ;;  %v323_v6 = vcombine.high %v33_v4, %v33_v4  ;;  %v322_v7 = vcombine.low %v33_v4, %v33_v4  ;;  %v399_v9 = vld [vmem:[%s553_s0] sm:$0xff]   ;;  %v400_v10 = vld [vmem:[%s553_s0 + $0x18] sm:$0xff]   ;;  %v403_v13 = vld [vmem:[%s553_s0 + $0x10] sm:$0xff]  }
   0x4   :  { %129 = vmatprep.subr.bf16.mxu0 %v394_v3  ;;  %385 = vmatprep.subr.bf16.mxu1 %v394_v3  ;;  %v402_v12 = vld [vmem:[%s553_s0 + $0x20] sm:$0xff]   ;;  %v404_v14 = vld [vmem:[%s553_s0 + $0x28] sm:$0x1f]   ;;  %v38_v17 = vsub.s32 0, %v37_v16  ;;  %v42_v19 = vsub.s32 1, %v37_v16 }
   0x5   :  { %v122_v8 = vsel %vm120_vm0, %v322_v7, 0  ;;  %v34_v18 = vld [vmem:[%s554_s2] sm:$0x3] }
   0x6   :  { %v467_v20 = vrot.slane %v34_v18, %v38_v17  ;;  %v469_v21 = vrot.slane %v34_v18, %v42_v19 }
   0x7   :  { %130 = vmatpush1.bf16.msra.mxu0 %v396_v5  ;;  %388 = vmatpush1.bf16.msra.mxu1 %v396_v5 }
   0x8   :  { %324 = vmatprep.subr.msk.bf16.mxu0 %vm120_vm0, %v323_v6  ;;  %386 = vmatprep.subr.msk.bf16.mxu1 %vm120_vm0, %v323_v6 }
   0xb   :  { %132 = vmatpush1.bf16.msra.mxu0 %v122_v8  ;;  %389 = vmatpush1.bf16.msra.mxu1 %v122_v8 }
   0xe   :  { %325 = vmatmul.mubr.msk.bf16.vlgmr.msra.gmra.mrb[0].mxu0 %vm101_vm1, %v399_v9  ;;  %328 = vmatmul.mubr.msk.bf16.vlgmr.msra.gmra.mrb[0].mxu1 %vm101_vm1, %v400_v10 }
   0xf   :  { %169 = vmatprep.mubr.bf16.mxu0 %v405_v1  ;;  %199 = vmatprep.mubr.bf16.mxu1 %v405_v1 }
  0x16   :  { %326 = vmatmul.mubr.msk.bf16.gmra.mrb[4].mxu0 %vm101_vm1, %v401_v11  ;;  %329 = vmatmul.mubr.msk.bf16.gmra.mrb[4].mxu1 %vm101_vm1, %v402_v12 }
  0x17   :  { %179 = vmatprep.mubr.bf16.mxu0 %v405_v1  ;;  %209 = vmatprep.mubr.bf16.mxu1 %v405_v1 }
  0x1e   :  { %327 = vmatmul.mubr.msk.bf16.gmra.mrb[8].mxu0 %vm101_vm1, %v403_v13  ;;  %330 = vmatmul.mubr.msk.bf16.gmra.mrb[8].mxu1 %vm101_vm1, %v404_v14 }
  0xe1   :  { %v161_v22 = vpop.f32.mrb[0].mxu0  ;;  %v191_v23 = vpop.f32.mrb[0].mxu1 }
  0xe2   :  { %v162_v24 = vadd.f32 %v161_v22, %v467_v20  ;;  %v192_v25 = vadd.f32 %v191_v23, %v467_v20  ;;  %v163_v26 = vpop.f32.mrb[1].mxu0  ;;  %v193_v27 = vpop.f32.mrb[1].mxu1 }
  0xe3   :  { %v164_v28 = vadd.f32 %v163_v26, %v469_v21  ;;  %v194_v29 = vadd.f32 %v193_v27, %v469_v21  ;;  %v165_v30 = vpop.f32.mrb[2].mxu0  ;;  %v195_v31 = vpop.f32.mrb[2].mxu1 }
  0xe4   :  { %v166_v32 = vadd.f32 %v165_v30, %v467_v20  ;;  %v196_v33 = vadd.f32 %v195_v31, %v467_v20  ;;  %v167_v34 = vpop.f32.mrb[3].mxu0  ;;  %v197_v35 = vpop.f32.mrb[3].mxu1  ;;  %v220_v38 = vmax.f32 %v162_v24, 0.0  ;;  %v226_v39 = vmax.f32 %v192_v25, 0.0 }
  0xe5   :  { %292 = vst [vmem:[%s555_s4] sm:$0xff] %v164_v28  ;;  %298 = vst [vmem:[%s555_s4 + $0x30] sm:$0xff] %v194_v29  ;;  %v168_v36 = vadd.f32 %v167_v34, %v469_v21  ;;  %v198_v37 = vadd.f32 %v197_v35, %v469_v21 }
  0xe6   :  { %v221_v40 = vmax.f32 %v166_v32, 0.0  ;;  %v227_v41 = vmax.f32 %v196_v33, 0.0 }
  0xe7   :  { %293 = vst [vmem:[%s555_s4 + $0x8] sm:$0xff] %v168_v36  ;;  %299 = vst [vmem:[%s555_s4 + $0x38] sm:$0xff] %v198_v37 }
  0xe8   :  { %v358_v42 = vpack.c.bf16 %v221_v40, %v220_v38  ;;  %v373_v43 = vpack.c.bf16 %v227_v41, %v226_v39 }
  0xe9   :  { %v171_v44 = vpop.f32.mrb[4].mxu0  ;;  %v201_v45 = vpop.f32.mrb[4].mxu1 }
  0xea   :  { %359 = vst [vmem:[%s556_s3] sm:$0xff] %v358_v42   ;;  %382 = vst [vmem:[%s556_s3 + $0x18] sm:$0xff] %v373_v43   ;;  %v172_v46 = vadd.f32 %v171_v44, %v467_v20  ;;  %v202_v47 = vadd.f32 %v201_v45, %v467_v20  ;;  %v173_v48 = vpop.f32.mrb[5].mxu0  ;;  %v203_v49 = vpop.f32.mrb[5].mxu1 }
  0xeb   :  { %v174_v50 = vadd.f32 %v173_v48, %v469_v21  ;;  %v204_v51 = vadd.f32 %v203_v49, %v469_v21  ;;  %v175_v52 = vpop.f32.mrb[6].mxu0  ;;  %v205_v53 = vpop.f32.mrb[6].mxu1 }
  0xec   :  { %v176_v54 = vadd.f32 %v175_v52, %v467_v20  ;;  %v206_v55 = vadd.f32 %v205_v53, %v467_v20  ;;  %v177_v56 = vpop.f32.mrb[7].mxu0  ;;  %v207_v57 = vpop.f32.mrb[7].mxu1  ;;  %v222_v60 = vmax.f32 %v172_v46, 0.0  ;;  %v228_v61 = vmax.f32 %v202_v47, 0.0 }
  0xed   :  { %294 = vst [vmem:[%s555_s4 + $0x10] sm:$0xff] %v174_v50  ;;  %300 = vst [vmem:[%s555_s4 + $0x40] sm:$0xff] %v204_v51  ;;  %v178_v58 = vadd.f32 %v177_v56, %v469_v21  ;;  %v208_v59 = vadd.f32 %v207_v57, %v469_v21 }
  0xee   :  { %v223_v62 = vmax.f32 %v176_v54, 0.0  ;;  %v229_v63 = vmax.f32 %v206_v55, 0.0 }
  0xef   :  { %295 = vst [vmem:[%s555_s4 + $0x18] sm:$0xff] %v178_v58  ;;  %301 = vst [vmem:[%s555_s4 + $0x48] sm:$0xff] %v208_v59 }
  0xf0   :  { %v363_v0 = vpack.c.bf16 %v223_v62, %v222_v60  ;;  %v378_v1 = vpack.c.bf16 %v229_v63, %v228_v61 }
  0xf1   :  { %v181_v2 = vpop.f32.mrb[8].mxu0  ;;  %v211_v3 = vpop.f32.mrb[8].mxu1 }
  0xf2   :  { %380 = vst [vmem:[%s556_s3 + $0x8] sm:$0xff] %v363_v0   ;;  %383 = vst [vmem:[%s556_s3 + $0x20] sm:$0xff] %v378_v1   ;;  %v182_v4 = vadd.f32 %v181_v2, %v467_v20  ;;  %v212_v5 = vadd.f32 %v211_v3, %v467_v20  ;;  %v183_v6 = vpop.f32.mrb[9].mxu0  ;;  %v213_v7 = vpop.f32.mrb[9].mxu1 }
  0xf3   :  { %v184_v8 = vadd.f32 %v183_v6, %v469_v21  ;;  %v214_v9 = vadd.f32 %v213_v7, %v469_v21  ;;  %v185_v10 = vpop.f32.mrb[10].mxu0  ;;  %v215_v11 = vpop.f32.mrb[10].mxu1 }
  0xf4   :  { %v230_v12 = vmax.f32 %v212_v5, 0.0  ;;  %v186_v13 = vadd.f32 %v185_v10, %v467_v20  ;;  %v216_v14 = vadd.f32 %v215_v11, %v467_v20  ;;  %v187_v15 = vpop.f32.mrb[11].mxu0  ;;  %v217_v16 = vpop.f32.mrb[11].mxu1  ;;  %v224_v19 = vmax.f32 %v182_v4, 0.0 }
  0xf5   :  { %296 = vst [vmem:[%s555_s4 + $0x20] sm:$0xff] %v184_v8  ;;  %302 = vst [vmem:[%s555_s4 + $0x50] sm:$0xff] %v214_v9  ;;  %v188_v17 = vadd.f32 %v187_v15, %v469_v21  ;;  %v218_v18 = vadd.f32 %v217_v16, %v469_v21 }
  0xf6   :  { %v353_v22 = vpack.c.bf16 %v230_v12, %v230_v12  ;;  %v225_v23 = vmax.f32 %v186_v13, 0.0  ;;  %v231_v24 = vmax.f32 %v216_v14, 0.0 }
  0xf7   :  { %297 = vst [vmem:[%s555_s4 + $0x28] sm:$0xff] %v188_v17  ;;  %303 = vst [vmem:[%s555_s4 + $0x58] sm:$0x3] %v218_v18 }
  0xf8   :  { %290 = vst [vmem:[%s556_s3 + $0x28] sm:$0xf] %v353_v22  ;;  %v368_v20 = vpack.c.bf16 %v225_v23, %v224_v19  ;;  %v354_v25 = vpack.c.bf16 %v231_v24, %v231_v24 }
  0xfa   :  { %381 = vst [vmem:[%s556_s3 + $0x10] sm:$0xff] %v368_v20   ;;  %291 = vst [vmem:[%s556_s3 + $0x2c] sm:$0x1] %v354_v25 }

// kernel: contrawr_forward.8
= control target key start
LH: loop header
LB: loop body
LE: loop exit
PB: predicated region body
PF: predicated region fallthrough
CT: control target
= control target key end

     0   :  { %vm283_vm0 = vcmask 261120   ;;  %s909_s1 = inlined_call_operand.vmem [shape: bf16[288,128], index: 1, kind: input, shape index: {}]   ;;  %s910_s0 = inlined_call_operand.vmem [shape: bf16[90,288], index: 0, kind: input, shape index: {}]   ;;  %s911_s2 = inlined_call_operand.vmem [shape: f32[1,128], index: 2, kind: input, shape index: {}]   ;;  %s912_s3 = inlined_call_operand.vmem [shape: f32[90,128], index: 3, kind: input, shape index: {}]   ;;  %s913_s4 = inlined_call_operand.vmem [shape: f32[90,128], index: 4, kind: output, shape index: {}]  }
   0x1   :  { %v639_v0 = vld [vmem:[%s909_s1 + $0x40] sm:$0xff]   ;;  %v641_v2 = vld [vmem:[%s909_s1 + $0x48] sm:$0xff]   ;;  %v643_v4 = vld [vmem:[%s909_s1 + $0x50] sm:$0xff]  }
   0x2   :  { %v640_v1 = vld [vmem:[%s909_s1] sm:$0xff]   ;;  %547 = vmatprep.subr.bf16.mxu0 %v639_v0  ;;  %623 = vmatprep.subr.bf16.mxu1 %v639_v0  ;;  %v642_v3 = vld [vmem:[%s909_s1 + $0x8] sm:$0xff]   ;;  %v644_v5 = vld [vmem:[%s909_s1 + $0x10] sm:$0xff]  }
   0x3   :  { %548 = vmatpush3.bf16.msra.mxu0 %v640_v1  ;;  %631 = vmatpush3.bf16.msra.mxu1 %v640_v1  ;;  %v645_v6 = vld [vmem:[%s909_s1 + $0x58] sm:$0xff]   ;;  %v647_v8 = vld [vmem:[%s909_s1 + $0x60] sm:$0xff]   ;;  %v649_v10 = vld [vmem:[%s909_s1 + $0x68] sm:$0xff]  }
   0x4   :  { %549 = vmatprep.subr.bf16.mxu0 %v641_v2  ;;  %624 = vmatprep.subr.bf16.mxu1 %v641_v2  ;;  %v646_v7 = vld [vmem:[%s909_s1 + $0x18] sm:$0xff]   ;;  %v648_v9 = vld [vmem:[%s909_s1 + $0x20] sm:$0xff]   ;;  %v650_v13 = vld [vmem:[%s909_s1 + $0x28] sm:$0xff]  }
   0x5   :  { %v657_v11 = vld [vmem:[%s910_s0 + $0x4] ss:$12 sps:$4 sm:$0xff]   ;;  %v660_v12 = vld [vmem:[%s910_s0 + $0x7c] ss:$12 sps:$4 sm:$0x1f]  }
   0x6   :  { %v651_v14 = vld [vmem:[%s909_s1 + $0x70] sm:$0xff]   ;;  %334 = vmatprep.mubr.bf16.mxu0 %v657_v11  ;;  %374 = vmatprep.mubr.bf16.mxu1 %v660_v12  ;;  %v653_v16 = vld [vmem:[%s909_s1 + $0x78] sm:$0xff]   ;;  %v655_v18 = vld [vmem:[%s910_s0] ss:$12 sps:$4 sm:$0xff]  }
   0x7   :  { %550 = vmatpush3.bf16.msra.mxu0 %v642_v3  ;;  %632 = vmatpush3.bf16.msra.mxu1 %v642_v3  ;;  %v652_v15 = vld [vmem:[%s909_s1 + $0x30] sm:$0xff]   ;;  %v654_v17 = vld [vmem:[%s909_s1 + $0x38] sm:$0xff]   ;;  %v661_v19 = vld [vmem:[%s909_s1 + $0x80] sm:$0xff]  }
   0x8   :  { %551 = vmatprep.subr.bf16.mxu0 %v643_v4  ;;  %625 = vmatprep.subr.bf16.mxu1 %v643_v4  ;;  %v658_v20 = vld [vmem:[%s910_s0 + $0x78] ss:$12 sps:$4 sm:$0x1f]   ;;  %v663_v21 = vld [vmem:[%s910_s0 + $0x1c] ss:$12 sps:$4 sm:$0xff]   ;;  %v466_v3 = vld [vmem:[%s912_s3 + $0x10] sm:$0xff] }
   0x9   :  { %v662_v22 = vld [vmem:[%s909_s1 + $0x88] sm:$0xff]   ;;  %v666_v24 = vld [vmem:[%s910_s0 + $0x18] ss:$12 sps:$4 sm:$0xff]   ;;  %v668_v26 = vld [vmem:[%s910_s0 + $0x34] ss:$12 sps:$4 sm:$0xff]  }
   0xa   :  { %v665_v23 = vld [vmem:[%s910_s0 + $0x8] ss:$12 sps:$4 sm:$0xff]   ;;  %v667_v25 = vld [vmem:[%s910_s0 + $0x20] ss:$12 sps:$4 sm:$0xff]   ;;  %v670_v27 = vld [vmem:[%s910_s0 + $0x38] ss:$12 sps:$4 sm:$0xff]  }
   0xb   :  { %552 = vmatpush3.bf16.msra.mxu0 %v644_v5  ;;  %633 = vmatpush3.bf16.msra.mxu1 %v644_v5  ;;  %v671_v28 = vld [vmem:[%s910_s0 + $0x30] ss:$12 sps:$4 sm:$0xff]   ;;  %v673_v30 = vld [vmem:[%s910_s0 + $0x4c] ss:$12 sps:$4 sm:$0xff]   ;;  %v675_v31 = vld [vmem:[%s910_s0 + $0x68] ss:$12 sps:$4 sm:$0xff]  }
   0xc   :  { %553 = vmatprep.subr.bf16.mxu0 %v645_v6  ;;  %626 = vmatprep.subr.bf16.mxu1 %v645_v6  ;;  %v672_v29 = vld [vmem:[%s910_s0 + $0x50] ss:$12 sps:$4 sm:$0xff]   ;;  %v676_v32 = vld [vmem:[%s910_s0 + $0x48] ss:$12 sps:$4 sm:$0xff]   ;;  %v680_v35 = vld [vmem:[%s910_s0 + $0x60] ss:$12 sps:$4 sm:$0xff]  }
   0xd   :  { %v677_v33 = vld [vmem:[%s910_s0 + $0x80] ss:$12 sps:$4 sm:$0x1f]   ;;  %v678_v34 = vld [vmem:[%s910_s0 + $0x64] ss:$12 sps:$4 sm:$0xff]  }
   0xe   :  { %v823_v48 = vld [vmem:[%s911_s2] ss:$0 sm:$0xff]  ;;  %v465_v62 = vld [vmem:[%s912_s3 + $0x8] sm:$0xff] }
   0xf   :  { %554 = vmatpush3.bf16.msra.mxu0 %v646_v7  ;;  %634 = vmatpush3.bf16.msra.mxu1 %v646_v7  ;;  %v464_v54 = vld [vmem:[%s912_s3] sm:$0xff]  ;;  %v467_v7 = vld [vmem:[%s912_s3 + $0x18] sm:$0xff] }
  0x10   :  { %555 = vmatprep.subr.bf16.mxu0 %v647_v8  ;;  %627 = vmatprep.subr.bf16.mxu1 %v647_v8 }
  0x13   :  { %556 = vmatpush3.bf16.msra.mxu0 %v648_v9  ;;  %635 = vmatpush3.bf16.msra.mxu1 %v648_v9 }
  0x14   :  { %557 = vmatprep.subr.bf16.mxu0 %v649_v10  ;;  %628 = vmatprep.subr.bf16.mxu1 %v649_v10 }
  0x17   :  { %558 = vmatpush3.bf16.msra.mxu0 %v650_v13  ;;  %636 = vmatpush3.bf16.msra.mxu1 %v650_v13 }
  0x18   :  { %559 = vmatprep.subr.bf16.mxu0 %v651_v14  ;;  %629 = vmatprep.subr.bf16.mxu1 %v651_v14 }
  0x1b   :  { %560 = vmatpush3.bf16.msra.mxu0 %v652_v15  ;;  %637 = vmatpush3.bf16.msra.mxu1 %v652_v15 }
  0x1c   :  { %561 = vmatprep.subr.bf16.mxu0 %v653_v16  ;;  %630 = vmatprep.subr.bf16.mxu1 %v653_v16 }
  0x1f   :  { %562 = vmatpush3.bf16.msra.mxu0 %v654_v17  ;;  %638 = vmatpush3.bf16.msra.mxu1 %v654_v17 }
  0x20   :  { %607 = vmatprep.subr.bf16.mxu1 %v661_v19 }
  0x22   :  { %335 = vmatmul.mubr.bf16.vlgmr.msra.gmra.mrb[0].mxu0 %v655_v18  ;;  %375 = vmatmul.mubr.bf16.vlgmr.msra.gmra.mrb[0].mxu1 %v658_v20 }
  0x23   :  { %608 = vmatpush3.bf16.msra.mxu1 %v661_v19  ;;  %342 = vmatprep.mubr.bf16.mxu0 %v663_v21 }
  0x24   :  { %609 = vmatprep.subr.bf16.mxu1 %v662_v22  ;;  %611 = vmatprep.mubr.msk.bf16.mxu1 %vm283_vm0, %v665_v23 }
  0x27   :  { %610 = vmatpush3.bf16.msra.mxu1 %v662_v22  ;;  %v468_v22 = vld [vmem:[%s912_s3 + $0x20] sm:$0xff] }
  0x2a   :  { %343 = vmatmul.mubr.bf16.gmra.mrb[4].mxu0 %v666_v24  ;;  %612 = vmatmul.mubr.msk.bf16.vlgmr.msra.gmra.mrb[4].mxu1 %vm283_vm0, %v667_v25  ;;  %v469_v25 = vld [vmem:[%s912_s3 + $0x28] sm:$0xff] }
  0x2b   :  { %350 = vmatprep.mubr.bf16.mxu0 %v668_v26  ;;  %615 = vmatprep.mubr.msk.bf16.mxu1 %vm283_vm0, %v670_v27 }
  0x32   :  { %351 = vmatmul.mubr.bf16.gmra.mrb[8].mxu0 %v671_v28  ;;  %616 = vmatmul.mubr.msk.bf16.gmra.mrb[8].mxu1 %vm283_vm0, %v672_v29 }
  0x33   :  { %358 = vmatprep.mubr.bf16.mxu0 %v673_v30  ;;  %619 = vmatprep.mubr.msk.bf16.mxu1 %vm283_vm0, %v675_v31  ;;  %v474_v31 = vld [vmem:[%s912_s3 + $0x50] sm:$0xff] }
  0x3a   :  { %359 = vmatmul.mubr.bf16.gmra.mrb[12].mxu0 %v676_v32  ;;  %620 = vmatmul.mubr.msk.bf16.gmra.mrb[12].mxu1 %vm283_vm0, %v677_v33 }
  0x3b   :  { %366 = vmatprep.mubr.bf16.mxu0 %v678_v34 }
  0x42   :  { %367 = vmatmul.mubr.bf16.gmra.mrb[16].mxu0 %v680_v35 }
  0xf5   :  { %v563_v36 = vpop.f32.mrb[0].mxu0  ;;  %v593_v37 = vpop.f32.mrb[0].mxu1 }
  0xf6   :  { %v564_v38 = vpop.f32.mrb[1].mxu0  ;;  %v594_v39 = vpop.f32.mrb[1].mxu1 }
  0xf7   :  { %v565_v40 = vadd.f32 %v564_v38, %v563_v36  ;;  %v566_v41 = vpop.f32.mrb[2].mxu0  ;;  %v595_v42 = vadd.f32 %v594_v39, %v593_v37  ;;  %v596_v43 = vpop.f32.mrb[2].mxu1 }
  0xf8   :  { %v567_v44 = vpop.f32.mrb[3].mxu0  ;;  %v597_v45 = vpop.f32.mrb[3].mxu1 }
  0xf9   :  { %v568_v46 = vadd.f32 %v567_v44, %v566_v41  ;;  %v598_v47 = vadd.f32 %v597_v45, %v596_v43  ;;  %v337_v51 = vadd.f32 %v565_v40, %v823_v48  ;;  %v377_v26 = vadd.f32 %v595_v42, %v823_v48  ;;  %v475_v40 = vld [vmem:[%s912_s3 + $0x58] sm:$0x3] }
  0xfb   :  { %v340_v59 = vadd.f32 %v568_v46, %v823_v48  ;;  %v380_v35 = vadd.f32 %v598_v47, %v823_v48  ;;  %v470_v47 = vld [vmem:[%s912_s3 + $0x30] sm:$0xff] }
  0xfd   :  { %v569_v49 = vpop.f32.mrb[4].mxu0  ;;  %v613_v50 = vpop.f32.mrb[4].mxu1 }
  0xfe   :  { %v570_v52 = vpop.f32.mrb[5].mxu0  ;;  %v417_v53 = vpop.f32.mrb[5].mxu1 }
  0xff   :  { %v571_v55 = vadd.f32 %v570_v52, %v569_v49  ;;  %v418_v56 = vadd.f32 %v417_v53, %v337_v51  ;;  %v572_v57 = vpop.f32.mrb[6].mxu0  ;;  %v614_v58 = vpop.f32.mrb[6].mxu1  ;;  %v471_v52 = vld [vmem:[%s912_s3 + $0x38] sm:$0xff] }
 0x100   :  { %v573_v60 = vpop.f32.mrb[7].mxu0  ;;  %v420_v61 = vpop.f32.mrb[7].mxu1 }
 0x101   :  { %v345_v63 = vadd.f32 %v571_v55, %v823_v48  ;;  %v476_v0 = vadd.f32 %v464_v54, %v418_v56  ;;  %v574_v1 = vadd.f32 %v573_v60, %v572_v57  ;;  %v421_v2 = vadd.f32 %v420_v61, %v340_v59 }
 0x103   :  { %v426_v4 = vadd.f32 %v613_v50, %v345_v63  ;;  %488 = vst [vmem:[%s913_s4] sm:$0xff] %v476_v0  ;;  %v348_v5 = vadd.f32 %v574_v1, %v823_v48  ;;  %v477_v6 = vadd.f32 %v465_v62, %v421_v2  ;;  %v472_v63 = vld [vmem:[%s912_s3 + $0x40] sm:$0xff]  ;;  %v473_v2 = vld [vmem:[%s912_s3 + $0x48] sm:$0xff] }
 0x105   :  { %v478_v8 = vadd.f32 %v466_v3, %v426_v4  ;;  %v429_v9 = vadd.f32 %v614_v58, %v348_v5  ;;  %489 = vst [vmem:[%s913_s4 + $0x8] sm:$0xff] %v477_v6  ;;  %v575_v10 = vpop.f32.mrb[8].mxu0  ;;  %v617_v11 = vpop.f32.mrb[8].mxu1 }
 0x106   :  { %v576_v12 = vpop.f32.mrb[9].mxu0  ;;  %v433_v13 = vpop.f32.mrb[9].mxu1 }
 0x107   :  { %490 = vst [vmem:[%s913_s4 + $0x10] sm:$0xff] %v478_v8  ;;  %v479_v14 = vadd.f32 %v467_v7, %v429_v9  ;;  %v577_v15 = vadd.f32 %v576_v12, %v575_v10  ;;  %v578_v16 = vpop.f32.mrb[10].mxu0  ;;  %v618_v17 = vpop.f32.mrb[10].mxu1 }
 0x108   :  { %v579_v18 = vpop.f32.mrb[11].mxu0  ;;  %v436_v19 = vpop.f32.mrb[11].mxu1 }
 0x109   :  { %491 = vst [vmem:[%s913_s4 + $0x18] sm:$0xff] %v479_v14  ;;  %v580_v20 = vadd.f32 %v579_v18, %v578_v16  ;;  %v353_v21 = vadd.f32 %v577_v15, %v823_v48 }
 0x10b   :  { %v434_v23 = vadd.f32 %v433_v13, %v353_v21  ;;  %v356_v24 = vadd.f32 %v580_v20, %v823_v48 }
 0x10d   :  { %v480_v27 = vadd.f32 %v468_v22, %v434_v23  ;;  %v437_v28 = vadd.f32 %v436_v19, %v356_v24  ;;  %v581_v29 = vpop.f32.mrb[12].mxu0  ;;  %v621_v30 = vpop.f32.mrb[12].mxu1 }
 0x10e   :  { %v458_v32 = vadd.f32 %v621_v30, %v377_v26  ;;  %v582_v33 = vpop.f32.mrb[13].mxu0  ;;  %v449_v34 = vpop.f32.mrb[13].mxu1 }
 0x10f   :  { %492 = vst [vmem:[%s913_s4 + $0x20] sm:$0xff] %v480_v27  ;;  %v481_v36 = vadd.f32 %v469_v25, %v437_v28  ;;  %v583_v37 = vadd.f32 %v582_v33, %v581_v29  ;;  %v584_v38 = vpop.f32.mrb[14].mxu0  ;;  %v622_v39 = vpop.f32.mrb[14].mxu1 }
 0x110   :  { %v486_v41 = vadd.f32 %v474_v31, %v458_v32  ;;  %v461_v42 = vadd.f32 %v622_v39, %v380_v35  ;;  %v585_v43 = vpop.f32.mrb[15].mxu0  ;;  %v452_v44 = vpop.f32.mrb[15].mxu1 }
 0x111   :  { %493 = vst [vmem:[%s913_s4 + $0x28] sm:$0xff] %v481_v36  ;;  %v361_v45 = vadd.f32 %v583_v37, %v823_v48  ;;  %v586_v46 = vadd.f32 %v585_v43, %v584_v38 }
 0x112   :  { %498 = vst [vmem:[%s913_s4 + $0x50] sm:$0xff] %v486_v41  ;;  %v487_v49 = vadd.f32 %v475_v40, %v461_v42 }
 0x113   :  { %v442_v50 = vadd.f32 %v617_v11, %v361_v45  ;;  %v364_v51 = vadd.f32 %v586_v46, %v823_v48 }
 0x114   :  { %499 = vst [vmem:[%s913_s4 + $0x58] sm:$0x3] %v487_v49 }
 0x115   :  { %v482_v53 = vadd.f32 %v470_v47, %v442_v50  ;;  %v445_v54 = vadd.f32 %v618_v17, %v364_v51  ;;  %v587_v55 = vpop.f32.mrb[16].mxu0 }
 0x116   :  { %v588_v56 = vpop.f32.mrb[17].mxu0 }
 0x117   :  { %494 = vst [vmem:[%s913_s4 + $0x30] sm:$0xff] %v482_v53  ;;  %v483_v57 = vadd.f32 %v471_v52, %v445_v54  ;;  %v589_v58 = vadd.f32 %v588_v56, %v587_v55  ;;  %v590_v59 = vpop.f32.mrb[18].mxu0 }
 0x118   :  { %v591_v60 = vpop.f32.mrb[19].mxu0 }
 0x119   :  { %495 = vst [vmem:[%s913_s4 + $0x38] sm:$0xff] %v483_v57  ;;  %v369_v61 = vadd.f32 %v589_v58, %v823_v48  ;;  %v592_v62 = vadd.f32 %v591_v60, %v590_v59 }
 0x11b   :  { %v450_v0 = vadd.f32 %v449_v34, %v369_v61  ;;  %v372_v1 = vadd.f32 %v592_v62, %v823_v48 }
 0x11d   :  { %v484_v3 = vadd.f32 %v472_v63, %v450_v0  ;;  %v453_v4 = vadd.f32 %v452_v44, %v372_v1 }
 0x11f   :  { %496 = vst [vmem:[%s913_s4 + $0x40] sm:$0xff] %v484_v3  ;;  %v485_v5 = vadd.f32 %v473_v2, %v453_v4 }
 0x121   :  { %497 = vst [vmem:[%s913_s4 + $0x48] sm:$0xff] %v485_v5 }

// kernel: contrawr_forward.9
= control target key start
LH: loop header
LB: loop body
LE: loop exit
PB: predicated region body
PF: predicated region fallthrough
CT: control target
= control target key end

     0   :  { %v487_v1 = vmov 0   ;;  %vm264_vm0 = vcmask 261120   ;;  %v59_v44 = vlaneseq  ;;  %s645_s1 = inlined_call_operand.vmem [shape: bf16[288,256], index: 1, kind: input, shape index: {}]   ;;  %s646_s0 = inlined_call_operand.vmem [shape: bf16[12,288], index: 0, kind: input, shape index: {}]   ;;  %s647_s2 = inlined_call_operand.vmem [shape: f32[1,256], index: 2, kind: input, shape index: {}]   ;;  %s648_s4 = inlined_call_operand.vmem [shape: f32[12,128], index: 4, kind: output, shape index: {1}]   ;;  %s649_s3 = inlined_call_operand.vmem [shape: bf16[12,128], index: 3, kind: output, shape index: {0}]  }
   0x1   :  { %v429_v0 = vld [vmem:[%s645_s1 + $0x4] ss:$8 sps:$4 sm:$0xff]   ;;  %343 = vmatprep.mubr.bf16.mxu0 %v487_v1  ;;  %v431_v2 = vld [vmem:[%s645_s1] ss:$8 sps:$4 sm:$0xff]   ;;  %v432_v3 = vld [vmem:[%s645_s1 + $0x14] ss:$8 sps:$4 sm:$0xff]  }
   0x2   :  { %268 = vmatprep.subr.bf16.mxu1 %v429_v0  ;;  %v434_v4 = vld [vmem:[%s645_s1 + $0x10] ss:$8 sps:$4 sm:$0xff]   ;;  %v435_v5 = vld [vmem:[%s645_s1 + $0x24] ss:$8 sps:$4 sm:$0xff]   ;;  %v437_v6 = vld [vmem:[%s645_s1 + $0x20] ss:$8 sps:$4 sm:$0xff]  }
   0x3   :  { %269 = vmatpush1.bf16.msra.mxu1 %v431_v2  ;;  %v438_v7 = vld [vmem:[%s645_s1 + $0x34] ss:$8 sps:$4 sm:$0xff]   ;;  %v440_v8 = vld [vmem:[%s645_s1 + $0x30] ss:$8 sps:$4 sm:$0xff]   ;;  %v441_v9 = vld [vmem:[%s645_s1 + $0x44] ss:$8 sps:$4 sm:$0xff]  }
   0x4   :  { %270 = vmatprep.subr.bf16.mxu1 %v432_v3  ;;  %v443_v10 = vld [vmem:[%s645_s1 + $0x40] ss:$8 sps:$4 sm:$0xff]   ;;  %v444_v11 = vld [vmem:[%s645_s1 + $0x54] ss:$8 sps:$4 sm:$0xff]   ;;  %v446_v12 = vld [vmem:[%s645_s1 + $0x50] ss:$8 sps:$4 sm:$0xff]  }
   0x5   :  { %v471_v13 = vld [vmem:[%s645_s1 + $0x104] ss:$8 sps:$4 sm:$0xff]   ;;  %v475_v15 = vld [vmem:[%s645_s1 + $0x100] ss:$8 sps:$4 sm:$0xff]   ;;  %v477_v16 = vld [vmem:[%s645_s1 + $0x114] ss:$8 sps:$4 sm:$0xff]  }
   0x6   :  { %v447_v14 = vld [vmem:[%s645_s1 + $0x64] ss:$8 sps:$4 sm:$0xff]   ;;  %311 = vmatprep.subr.bf16.mxu0 %v471_v13  ;;  %v449_v17 = vld [vmem:[%s645_s1 + $0x60] ss:$8 sps:$4 sm:$0xff]   ;;  %v481_v18 = vld [vmem:[%s645_s1 + $0x110] ss:$8 sps:$4 sm:$0xff]  }
   0x7   :  { %271 = vmatpush1.bf16.msra.mxu1 %v434_v4  ;;  %312 = vmatpush1.bf16.msra.mxu0 %v475_v15  ;;  %v450_v19 = vld [vmem:[%s645_s1 + $0x74] ss:$8 sps:$4 sm:$0xff]   ;;  %v485_v20 = vld [vmem:[%s646_s0 + $0x4] ss:$12 sps:$4 sm:$0x3f]   ;;  %v60_v45 = vshrl.u32 %v59_v44, 7 }
   0x8   :  { %272 = vmatprep.subr.bf16.mxu1 %v435_v5  ;;  %313 = vmatprep.subr.bf16.mxu0 %v477_v16  ;;  %v486_v21 = vld [vmem:[%s646_s0 + $0x8] ss:$12 sps:$4 sm:$0x3f]   ;;  %v452_v22 = vld [vmem:[%s645_s1 + $0x70] ss:$8 sps:$4 sm:$0xff]  }
   0x9   :  { %300 = vmatprep.mubr.bf16.mxu1 %v485_v20  ;;  %v453_v23 = vld [vmem:[%s645_s1 + $0x84] ss:$8 sps:$4 sm:$0xff]   ;;  %v455_v24 = vld [vmem:[%s645_s1 + $0x80] ss:$8 sps:$4 sm:$0xff]   ;;  %v456_v25 = vld [vmem:[%s645_s1 + $0x94] ss:$8 sps:$4 sm:$0xff]  }
   0xa   :  { %v458_v26 = vld [vmem:[%s645_s1 + $0x90] ss:$8 sps:$4 sm:$0xff]   ;;  %v459_v27 = vld [vmem:[%s645_s1 + $0xa4] ss:$8 sps:$4 sm:$0xff]   ;;  %v461_v28 = vld [vmem:[%s645_s1 + $0xa0] ss:$8 sps:$4 sm:$0xff]  }
   0xb   :  { %273 = vmatpush1.bf16.msra.mxu1 %v437_v6  ;;  %314 = vmatpush1.bf16.msra.mxu0 %v481_v18  ;;  %v462_v29 = vld [vmem:[%s645_s1 + $0xb4] ss:$8 sps:$4 sm:$0xff]   ;;  %v464_v30 = vld [vmem:[%s645_s1 + $0xb0] ss:$8 sps:$4 sm:$0xff]   ;;  %v465_v31 = vld [vmem:[%s645_s1 + $0xc4] ss:$8 sps:$4 sm:$0xff]  }
   0xc   :  { %274 = vmatprep.subr.bf16.mxu1 %v438_v7  ;;  %v467_v32 = vld [vmem:[%s645_s1 + $0xc0] ss:$8 sps:$4 sm:$0xff]   ;;  %v468_v33 = vld [vmem:[%s645_s1 + $0xd4] ss:$8 sps:$4 sm:$0xff]   ;;  %v470_v34 = vld [vmem:[%s645_s1 + $0xd0] ss:$8 sps:$4 sm:$0xff]  }
   0xd   :  { %v473_v35 = vld [vmem:[%s645_s1 + $0xe4] ss:$8 sps:$4 sm:$0xff]   ;;  %v476_v36 = vld [vmem:[%s645_s1 + $0xe0] ss:$8 sps:$4 sm:$0xff]   ;;  %v479_v37 = vld [vmem:[%s645_s1 + $0xf4] ss:$8 sps:$4 sm:$0xff]  }
   0xe   :  { %415 = vmatmul.mubr.msk.bf16.vlgmr.msra.gmra.mrb[0].mxu0 %vm264_vm0, %v486_v21  ;;  %v482_v38 = vld [vmem:[%s645_s1 + $0xf0] ss:$8 sps:$4 sm:$0xff]   ;;  %v483_v39 = vld [vmem:[%s646_s0] ss:$12 sps:$4 sm:$0x3f]   ;;  %v61_v46 = vsub.s32 0, %v60_v45 }
   0xf   :  { %275 = vmatpush1.bf16.msra.mxu1 %v440_v8  ;;  %v57_v47 = vld [vmem:[%s647_s2] sm:$0x3]  ;;  %v65_v48 = vsub.s32 1, %v60_v45 }
  0x10   :  { %276 = vmatprep.subr.bf16.mxu1 %v441_v9  ;;  %v62_v49 = vrot.slane %v57_v47, %v61_v46 }
  0x11   :  { %v66_v50 = vrot.slane %v57_v47, %v65_v48 }
  0x13   :  { %277 = vmatpush1.bf16.msra.mxu1 %v443_v10 }
  0x14   :  { %278 = vmatprep.subr.bf16.mxu1 %v444_v11 }
  0x17   :  { %279 = vmatpush1.bf16.msra.mxu1 %v446_v12 }
  0x18   :  { %280 = vmatprep.subr.bf16.mxu1 %v447_v14 }
  0x1b   :  { %281 = vmatpush1.bf16.msra.mxu1 %v449_v17 }
  0x1c   :  { %282 = vmatprep.subr.bf16.mxu1 %v450_v19 }
  0x1f   :  { %283 = vmatpush1.bf16.msra.mxu1 %v452_v22 }
  0x20   :  { %284 = vmatprep.subr.bf16.mxu1 %v453_v23 }
  0x23   :  { %285 = vmatpush1.bf16.msra.mxu1 %v455_v24 }
  0x24   :  { %286 = vmatprep.subr.bf16.mxu1 %v456_v25 }
  0x27   :  { %287 = vmatpush1.bf16.msra.mxu1 %v458_v26 }
  0x28   :  { %288 = vmatprep.subr.bf16.mxu1 %v459_v27 }
  0x2b   :  { %289 = vmatpush1.bf16.msra.mxu1 %v461_v28 }
  0x2c   :  { %290 = vmatprep.subr.bf16.mxu1 %v462_v29 }
  0x2f   :  { %291 = vmatpush1.bf16.msra.mxu1 %v464_v30 }
  0x30   :  { %292 = vmatprep.subr.bf16.mxu1 %v465_v31 }
  0x33   :  { %293 = vmatpush1.bf16.msra.mxu1 %v467_v32 }
  0x34   :  { %294 = vmatprep.subr.bf16.mxu1 %v468_v33 }
  0x37   :  { %295 = vmatpush1.bf16.msra.mxu1 %v470_v34 }
  0x38   :  { %296 = vmatprep.subr.bf16.mxu1 %v473_v35 }
  0x3b   :  { %297 = vmatpush1.bf16.msra.mxu1 %v476_v36 }
  0x3c   :  { %298 = vmatprep.subr.bf16.mxu1 %v479_v37 }
  0x3f   :  { %299 = vmatpush1.bf16.msra.mxu1 %v482_v38 }
  0x42   :  { %301 = vmatmul.mubr.bf16.vlgmr.msra.gmra.mrb[0].mxu1 %v483_v39 }
  0xe1   :  { %v345_v40 = vpop.f32.mrb[0].mxu0 }
  0xe2   :  { %v347_v41 = vpop.f32.mrb[1].mxu0 }
  0xe3   :  { %v349_v42 = vpop.f32.mrb[2].mxu0 }
  0xe4   :  { %v351_v43 = vpop.f32.mrb[3].mxu0 }
 0x115   :  { %v302_v51 = vpop.f32.mrb[0].mxu1 }
 0x116   :  { %v303_v52 = vadd.f32 %v302_v51, %v62_v49  ;;  %v304_v53 = vpop.f32.mrb[1].mxu1 }
 0x117   :  { %v305_v54 = vadd.f32 %v304_v53, %v66_v50  ;;  %v306_v55 = vpop.f32.mrb[2].mxu1 }
 0x118   :  { %v346_v56 = vadd.f32 %v345_v40, %v303_v52  ;;  %v307_v57 = vadd.f32 %v306_v55, %v62_v49  ;;  %v308_v58 = vpop.f32.mrb[3].mxu1 }
 0x119   :  { %v348_v59 = vadd.f32 %v347_v41, %v305_v54  ;;  %v309_v60 = vadd.f32 %v308_v58, %v66_v50 }
 0x11a   :  { %v354_v61 = vmax.f32 %v346_v56, 0.0  ;;  %v350_v62 = vadd.f32 %v349_v42, %v307_v57 }
 0x11b   :  { %366 = vst [vmem:[%s648_s4] sm:$0xff] %v348_v59  ;;  %v352_v63 = vadd.f32 %v351_v43, %v309_v60 }
 0x11c   :  { %v418_v0 = vpack.c.bf16 %v354_v61, %v354_v61  ;;  %v355_v1 = vmax.f32 %v350_v62, 0.0 }
 0x11d   :  { %367 = vst [vmem:[%s648_s4 + $0x8] sm:$0xf] %v352_v63 }
 0x11e   :  { %364 = vst [vmem:[%s649_s3] sm:$0xf] %v418_v0  ;;  %v419_v2 = vpack.c.bf16 %v355_v1, %v355_v1 }
 0x120   :  { %365 = vst [vmem:[%s649_s3 + $0x4] sm:$0x3] %v419_v2 }

// kernel: contrawr_forward.10
= control target key start
LH: loop header
LB: loop body
LE: loop exit
PB: predicated region body
PF: predicated region fallthrough
CT: control target
= control target key end

     0   :  { %v630_v34 = vmov 0.0   ;;  %vm631_vm0 = vmmov 0   ;;  %vm344_vm1 = vcmask 523264   ;;  %s795_s1 = inlined_call_operand.vmem [shape: bf16[576,128], index: 1, kind: input, shape index: {}]   ;;  %s796_s0 = inlined_call_operand.vmem [shape: bf16[12,576], index: 0, kind: input, shape index: {}]   ;;  %s797_s2 = inlined_call_operand.vmem [shape: f32[1,128], index: 2, kind: input, shape index: {}]   ;;  %s798_s3 = inlined_call_operand.vmem [shape: f32[12,128], index: 3, kind: input, shape index: {}]   ;;  %s799_s4 = inlined_call_operand.vmem [shape: f32[12,128], index: 4, kind: output, shape index: {}]  }
   0x1   :  { %v587_v0 = vld [vmem:[%s795_s1 + $0x40] sm:$0xff]   ;;  %v591_v4 = vld [vmem:[%s795_s1 + $0x48] sm:$0xff]   ;;  %v595_v8 = vld [vmem:[%s795_s1 + $0x50] sm:$0xff]  }
   0x2   :  { %v588_v1 = vld [vmem:[%s795_s1] sm:$0xff]   ;;  %524 = vmatprep.subr.bf16.mxu0 %v587_v0  ;;  %v592_v5 = vld [vmem:[%s795_s1 + $0x8] sm:$0xff]   ;;  %v596_v9 = vld [vmem:[%s795_s1 + $0x10] sm:$0xff]  }
   0x3   :  { %v589_v2 = vld [vmem:[%s795_s1 + $0xc0] sm:$0xff]   ;;  %525 = vmatpush3.bf16.msra.mxu0 %v588_v1  ;;  %v593_v6 = vld [vmem:[%s795_s1 + $0xc8] sm:$0xff]   ;;  %v597_v10 = vld [vmem:[%s795_s1 + $0xd0] sm:$0xff]  }
   0x4   :  { %v590_v3 = vld [vmem:[%s795_s1 + $0x80] sm:$0xff]   ;;  %546 = vmatprep.subr.bf16.mxu1 %v589_v2  ;;  %526 = vmatprep.subr.bf16.mxu0 %v591_v4  ;;  %v594_v7 = vld [vmem:[%s795_s1 + $0x88] sm:$0xff]   ;;  %v598_v11 = vld [vmem:[%s795_s1 + $0x90] sm:$0xff]  }
   0x5   :  { %547 = vmatpush3.bf16.msra.mxu1 %v590_v3  ;;  %v599_v12 = vld [vmem:[%s795_s1 + $0x58] sm:$0xff]   ;;  %v603_v16 = vld [vmem:[%s795_s1 + $0x60] sm:$0xff]   ;;  %v607_v20 = vld [vmem:[%s795_s1 + $0x68] sm:$0xff]  }
   0x6   :  { %548 = vmatprep.subr.bf16.mxu1 %v593_v6  ;;  %v600_v13 = vld [vmem:[%s795_s1 + $0x18] sm:$0xff]   ;;  %v604_v17 = vld [vmem:[%s795_s1 + $0x20] sm:$0xff]   ;;  %v608_v21 = vld [vmem:[%s795_s1 + $0x28] sm:$0xff]  }
   0x7   :  { %527 = vmatpush3.bf16.msra.mxu0 %v592_v5  ;;  %v601_v14 = vld [vmem:[%s795_s1 + $0xd8] sm:$0xff]   ;;  %v605_v18 = vld [vmem:[%s795_s1 + $0xe0] sm:$0xff]   ;;  %v609_v22 = vld [vmem:[%s795_s1 + $0xe8] sm:$0xff]  }
   0x8   :  { %528 = vmatprep.subr.bf16.mxu0 %v595_v8  ;;  %v602_v15 = vld [vmem:[%s795_s1 + $0x98] sm:$0xff]   ;;  %v606_v19 = vld [vmem:[%s795_s1 + $0xa0] sm:$0xff]   ;;  %v610_v23 = vld [vmem:[%s795_s1 + $0xa8] sm:$0xff]  }
   0x9   :  { %549 = vmatpush3.bf16.msra.mxu1 %v594_v7  ;;  %v611_v24 = vld [vmem:[%s795_s1 + $0x70] sm:$0xff]   ;;  %v615_v28 = vld [vmem:[%s795_s1 + $0x78] sm:$0xff]   ;;  %v624_v36 = vld [vmem:[%s796_s0 + $0xc] ss:$20 sps:$4 sm:$0x3f]  }
   0xa   :  { %550 = vmatprep.subr.bf16.mxu1 %v597_v10  ;;  %v612_v25 = vld [vmem:[%s795_s1 + $0x30] sm:$0xff]   ;;  %v616_v29 = vld [vmem:[%s795_s1 + $0x38] sm:$0xff]   ;;  %v625_v37 = vld [vmem:[%s795_s1 + $0x100] sm:$0xff]   ;;  %421 = vmatprep.mubr.bf16.mxu1 %v624_v36 }
   0xb   :  { %529 = vmatpush3.bf16.msra.mxu0 %v596_v9  ;;  %v613_v26 = vld [vmem:[%s795_s1 + $0xf0] sm:$0xff]   ;;  %v617_v30 = vld [vmem:[%s795_s1 + $0xf8] sm:$0xff]   ;;  %v626_v38 = vld [vmem:[%s795_s1 + $0x108] sm:$0xff]  }
   0xc   :  { %530 = vmatprep.subr.bf16.mxu0 %v599_v12  ;;  %v614_v27 = vld [vmem:[%s795_s1 + $0xb0] sm:$0xff]   ;;  %v620_v32 = vld [vmem:[%s796_s0 + $0x4] ss:$20 sps:$4 sm:$0x3f]   ;;  %v481_v43 = vld [vmem:[%s797_s2] ss:$0 sm:$0xff] }
   0xd   :  { %551 = vmatpush3.bf16.msra.mxu1 %v598_v11  ;;  %v618_v31 = vld [vmem:[%s796_s0] ss:$20 sps:$4 sm:$0x3f]   ;;  %v621_v33 = vld [vmem:[%s795_s1 + $0xb8] sm:$0xff]   ;;  %380 = vmatprep.mubr.bf16.mxu0 %v620_v32  ;;  %v472_v0 = vld [vmem:[%s798_s3 + $0x8] sm:$0xf] }
   0xe   :  { %552 = vmatprep.subr.bf16.mxu1 %v601_v14  ;;  %v622_v35 = vld [vmem:[%s796_s0 + $0x8] ss:$20 sps:$4 sm:$0x3f]   ;;  %v627_v39 = vld [vmem:[%s795_s1 + $0x110] sm:$0xff]   ;;  %v471_v60 = vld [vmem:[%s798_s3] sm:$0xff] }
   0xf   :  { %531 = vmatpush3.bf16.msra.mxu0 %v600_v13  ;;  %v628_v40 = vld [vmem:[%s795_s1 + $0x118] sm:$0xff]   ;;  %v629_v41 = vld [vmem:[%s796_s0 + $0x10] ss:$20 sps:$4 sm:$0x3f]  }
  0x10   :  { %532 = vmatprep.subr.bf16.mxu0 %v603_v16 }
  0x11   :  { %553 = vmatpush3.bf16.msra.mxu1 %v602_v15 }
  0x12   :  { %554 = vmatprep.subr.bf16.mxu1 %v605_v18 }
  0x13   :  { %533 = vmatpush3.bf16.msra.mxu0 %v604_v17 }
  0x14   :  { %534 = vmatprep.subr.bf16.mxu0 %v607_v20 }
  0x15   :  { %555 = vmatpush3.bf16.msra.mxu1 %v606_v19 }
  0x16   :  { %556 = vmatprep.subr.bf16.mxu1 %v609_v22 }
  0x17   :  { %535 = vmatpush3.bf16.msra.mxu0 %v608_v21 }
  0x18   :  { %536 = vmatprep.subr.bf16.mxu0 %v611_v24 }
  0x19   :  { %557 = vmatpush3.bf16.msra.mxu1 %v610_v23 }
  0x1a   :  { %558 = vmatprep.subr.bf16.mxu1 %v613_v26 }
  0x1b   :  { %537 = vmatpush3.bf16.msra.mxu0 %v612_v25 }
  0x1c   :  { %538 = vmatprep.subr.bf16.mxu0 %v615_v28 }
  0x1d   :  { %559 = vmatpush3.bf16.msra.mxu1 %v614_v27 }
  0x1e   :  { %560 = vmatprep.subr.bf16.mxu1 %v617_v30 }
  0x1f   :  { %539 = vmatpush3.bf16.msra.mxu0 %v616_v29 }
  0x20   :  { %573 = vmatprep.subr.bf16.mxu0 %v630_v34 }
  0x21   :  { %561 = vmatpush3.bf16.msra.mxu1 %v621_v33 }
  0x22   :  { %381 = vmatmul.mubr.bf16.vlgmr.msra.gmra.mrb[0].mxu0 %v618_v31 }
  0x23   :  { %581 = vmatprep.mubr.msk.bf16.mxu0 %vm631_vm0, %v630_v34  ;;  %574 = vmatpush3.bf16.msra.mxu0 %v625_v37 }
  0x24   :  { %422 = vmatmul.mubr.bf16.vlgmr.msra.gmra.mrb[0].mxu1 %v622_v35  ;;  %575 = vmatprep.subr.bf16.mxu0 %v630_v34 }
  0x27   :  { %576 = vmatpush3.bf16.msra.mxu0 %v626_v38 }
  0x28   :  { %577 = vmatprep.subr.bf16.mxu0 %v630_v34 }
  0x2b   :  { %578 = vmatpush3.bf16.msra.mxu0 %v627_v39 }
  0x2c   :  { %579 = vmatprep.subr.bf16.mxu0 %v630_v34 }
  0x2f   :  { %580 = vmatpush3.bf16.msra.mxu0 %v628_v40 }
  0x32   :  { %582 = vmatmul.mubr.msk.bf16.vlgmr.msra.gmra.mrb[4].mxu0 %vm344_vm1, %v629_v41 }
  0xf5   :  { %v540_v42 = vpop.f32.mrb[0].mxu0 }
  0xf6   :  { %v541_v44 = vpop.f32.mrb[1].mxu0 }
  0xf7   :  { %v542_v45 = vadd.f32 %v541_v44, %v540_v42  ;;  %v543_v46 = vpop.f32.mrb[2].mxu0  ;;  %v562_v47 = vpop.f32.mrb[0].mxu1 }
  0xf8   :  { %v544_v48 = vpop.f32.mrb[3].mxu0  ;;  %v563_v49 = vpop.f32.mrb[1].mxu1 }
  0xf9   :  { %v383_v50 = vadd.f32 %v542_v45, %v481_v43  ;;  %v545_v51 = vadd.f32 %v544_v48, %v543_v46  ;;  %v564_v52 = vadd.f32 %v563_v49, %v562_v47  ;;  %v565_v53 = vpop.f32.mrb[2].mxu1 }
  0xfa   :  { %v566_v54 = vpop.f32.mrb[3].mxu1 }
  0xfb   :  { %v386_v55 = vadd.f32 %v545_v51, %v481_v43  ;;  %v567_v56 = vadd.f32 %v566_v54, %v565_v53  ;;  %v424_v57 = vadd.f32 %v564_v52, %v383_v50 }
  0xfd   :  { %v427_v58 = vadd.f32 %v567_v56, %v386_v55 }
 0x105   :  { %v464_v59 = vpop.f32.mrb[4].mxu0 }
 0x106   :  { %v465_v61 = vadd.f32 %v464_v59, %v424_v57  ;;  %v583_v62 = vpop.f32.mrb[5].mxu0 }
 0x107   :  { %v467_v63 = vpop.f32.mrb[6].mxu0 }
 0x108   :  { %v473_v1 = vadd.f32 %v471_v60, %v465_v61  ;;  %v468_v2 = vadd.f32 %v467_v63, %v427_v58  ;;  %v584_v3 = vpop.f32.mrb[7].mxu0 }
 0x10a   :  { %475 = vst [vmem:[%s799_s4] sm:$0xff] %v473_v1  ;;  %v474_v4 = vadd.f32 %v472_v0, %v468_v2 }
 0x10c   :  { %476 = vst [vmem:[%s799_s4 + $0x8] sm:$0xf] %v474_v4 }

// kernel: contrawr_forward.11
= control target key start
LH: loop header
LB: loop body
LE: loop exit
PB: predicated region body
PF: predicated region fallthrough
CT: control target
= control target key end

     0   :  { %v1399_v2 = vmov 0   ;;  %v1400_v3 = vmov 0.0   ;;  %s1824_s0 = inlined_call_operand.vmem [shape: bf16[2,128], index: 0, kind: input, shape index: {}]   ;;  %s1825_s1 = inlined_call_operand.vmem [shape: bf16[128,256], index: 1, kind: input, shape index: {}]   ;;  %s1826_s2 = inlined_call_operand.vmem [shape: f32[1,256], index: 2, kind: input, shape index: {}]   ;;  %s1827_s3 = inlined_call_operand.vmem [shape: bf16[128,128], index: 3, kind: input, shape index: {}]   ;;  %s1828_s4 = inlined_call_operand.vmem [shape: f32[1,128], index: 4, kind: input, shape index: {}]   ;;  %s1829_s5 = inlined_call_operand.vmem [shape: bf16[128,512], index: 5, kind: input, shape index: {}]   ;;  %s1830_s6 = inlined_call_operand.vmem [shape: f32[1,512], index: 6, kind: input, shape index: {}]   ;;  %s1831_s7 = inlined_call_operand.vmem [shape: bf16[256,256], index: 7, kind: input, shape index: {}]   ;;  %s1832_s8 = inlined_call_operand.vmem [shape: f32[1,256], index: 8, kind: input, shape index: {}]   ;;  %s1833_s9 = inlined_call_operand.vmem [shape: bf16[256,128], index: 9, kind: input, shape index: {}]   ;;  %s1834_s10 = inlined_call_operand.vmem [shape: f32[1,128], index: 10, kind: input, shape index: {}]   ;;  %s1835_s11 = inlined_call_operand.hbm [shape: f32[2,128], index: 11, kind: output, shape index: {}]  }
   0x1   :  { %v1227_v0 = vld [vmem:[%s1825_s1 + $0x4] ss:$8 sps:$4 sm:$0xff]   ;;  %v1229_v1 = vld [vmem:[%s1825_s1] ss:$8 sps:$4 sm:$0xff]   ;;  %181 = vmatprep.mubr.bf16.mxu0 %v1399_v2  ;;  %1195 = vmatprep.subr.bf16.mxu1 %v1400_v3  ;;  %v1230_v4 = vld [vmem:[%s1825_s1 + $0x14] ss:$8 sps:$4 sm:$0xff]  }
   0x2   :  { %149 = vmatprep.subr.bf16.mxu0 %v1227_v0  ;;  %v1232_v5 = vld [vmem:[%s1825_s1 + $0x10] ss:$8 sps:$4 sm:$0xff]   ;;  %v1233_v6 = vld [vmem:[%s1825_s1 + $0x24] ss:$8 sps:$4 sm:$0xff]   ;;  %v1235_v7 = vld [vmem:[%s1825_s1 + $0x20] ss:$8 sps:$4 sm:$0xff]  }
   0x3   :  { %150 = vmatpush1.bf16.msra.mxu0 %v1229_v1  ;;  %v1236_v8 = vld [vmem:[%s1825_s1 + $0x34] ss:$8 sps:$4 sm:$0xff]   ;;  %v1238_v9 = vld [vmem:[%s1825_s1 + $0x30] ss:$8 sps:$4 sm:$0xff]   ;;  %v1251_v10 = vld [vmem:[%s1827_s3] sm:$0xff]  }
   0x4   :  { %151 = vmatprep.subr.bf16.mxu0 %v1230_v4  ;;  %v1239_v11 = vld [vmem:[%s1825_s1 + $0x44] ss:$8 sps:$4 sm:$0xff]   ;;  %1196 = vmatpush3.bf16.msra.mxu1 %v1251_v10  ;;  %v1241_v13 = vld [vmem:[%s1825_s1 + $0x40] ss:$8 sps:$4 sm:$0xff]   ;;  %v1242_v14 = vld [vmem:[%s1825_s1 + $0x54] ss:$8 sps:$4 sm:$0xff]  }
   0x5   :  { %v1252_v12 = vld [vmem:[%s1827_s3 + $0x8] sm:$0xff]   ;;  %1197 = vmatprep.subr.bf16.mxu1 %v1400_v3  ;;  %v1244_v15 = vld [vmem:[%s1825_s1 + $0x50] ss:$8 sps:$4 sm:$0xff]   ;;  %v1248_v20 = vld [vmem:[%s1825_s1 + $0x74] ss:$8 sps:$4 sm:$0xff]  }
   0x6   :  { %v1253_v16 = vld [vmem:[%s1827_s3 + $0x10] sm:$0xff]   ;;  %v1245_v17 = vld [vmem:[%s1825_s1 + $0x64] ss:$8 sps:$4 sm:$0xff]   ;;  %v1254_v18 = vld [vmem:[%s1827_s3 + $0x18] sm:$0xff]  }
   0x7   :  { %152 = vmatpush1.bf16.msra.mxu0 %v1232_v5  ;;  %v1247_v19 = vld [vmem:[%s1825_s1 + $0x60] ss:$8 sps:$4 sm:$0xff]   ;;  %v1250_v22 = vld [vmem:[%s1825_s1 + $0x70] ss:$8 sps:$4 sm:$0xff]  }
   0x8   :  { %153 = vmatprep.subr.bf16.mxu0 %v1233_v6  ;;  %1198 = vmatpush3.bf16.msra.mxu1 %v1252_v12  ;;  %v1255_v21 = vld [vmem:[%s1827_s3 + $0x20] sm:$0xff]   ;;  %v1256_v23 = vld [vmem:[%s1827_s3 + $0x28] sm:$0xff]  }
   0x9   :  { %1199 = vmatprep.subr.bf16.mxu1 %v1400_v3  ;;  %v40_v24 = vld [vmem:[%s1824_s0] sm:$0x1] }
   0xb   :  { %154 = vmatpush1.bf16.msra.mxu0 %v1235_v7 }
   0xc   :  { %155 = vmatprep.subr.bf16.mxu0 %v1236_v8  ;;  %1200 = vmatpush3.bf16.msra.mxu1 %v1253_v16 }
   0xd   :  { %1201 = vmatprep.subr.bf16.mxu1 %v1400_v3 }
   0xf   :  { %156 = vmatpush1.bf16.msra.mxu0 %v1238_v9 }
  0x10   :  { %157 = vmatprep.subr.bf16.mxu0 %v1239_v11  ;;  %1202 = vmatpush3.bf16.msra.mxu1 %v1254_v18 }
  0x11   :  { %1203 = vmatprep.subr.bf16.mxu1 %v1400_v3 }
  0x13   :  { %158 = vmatpush1.bf16.msra.mxu0 %v1241_v13 }
  0x14   :  { %159 = vmatprep.subr.bf16.mxu0 %v1242_v14  ;;  %1204 = vmatpush3.bf16.msra.mxu1 %v1255_v21 }
  0x15   :  { %1205 = vmatprep.subr.bf16.mxu1 %v1400_v3 }
  0x17   :  { %160 = vmatpush1.bf16.msra.mxu0 %v1244_v15 }
  0x18   :  { %161 = vmatprep.subr.bf16.mxu0 %v1245_v17  ;;  %1206 = vmatpush3.bf16.msra.mxu1 %v1256_v23 }
  0x19   :  { %1207 = vmatprep.subr.bf16.mxu1 %v1400_v3 }
  0x1b   :  { %162 = vmatpush1.bf16.msra.mxu0 %v1247_v19 }
  0x1c   :  { %163 = vmatprep.subr.bf16.mxu0 %v1248_v20 }
  0x1f   :  { %164 = vmatpush1.bf16.msra.mxu0 %v1250_v22 }
  0x22   :  { %182 = vmatmul.mubr.bf16.vlgmr.msra.gmra.mrb[0].mxu0 %v40_v24 }
  0x23   :  { %551 = vmatprep.mubr.bf16.mxu0 %v1399_v2 }
  0x24   :  { %16 = vsyncpa [#allocation3], 0  ;;  %v1257_v25 = vld [vmem:[%s1827_s3 + $0x30] sm:$0xff]   ;;  %v1258_v26 = vld [vmem:[%s1827_s3 + $0x38] sm:$0xff]   ;;  %vm1401_vm0 = vmmov 0   ;;  %v59_v42 = vlaneseq  ;;  %s1402_s25 = smov [#allocation2]  }
  0x25   :  { %1208 = vmatpush3.bf16.msra.mxu1 %v1257_v25  ;;  %1211 = vmatprep.mubr.msk.bf16.mxu1 %vm1401_vm0, %v1400_v3  ;;  %v1259_v27 = vld [vmem:[%s1829_s5] ss:$16 sps:$4 sm:$0xff]   ;;  %v1261_v28 = vld [vmem:[%s1829_s5 + $0x4] ss:$16 sps:$4 sm:$0xff]   ;;  %v1264_v29 = vld [vmem:[%s1829_s5 + $0xc] ss:$16 sps:$4 sm:$0xff]  }
  0x26   :  { %1209 = vmatprep.subr.bf16.mxu1 %v1400_v3  ;;  %v1267_v30 = vld [vmem:[%s1829_s5 + $0x24] ss:$16 sps:$4 sm:$0xff]   ;;  %519 = vmatprep.subr.bf16.mxu0 %v1261_v28  ;;  %v1265_v31 = vld [vmem:[%s1829_s5 + $0x20] ss:$16 sps:$4 sm:$0xff]   ;;  %v1585_v43 = vshrl.u32 %v59_v42, 7  ;;  %s1048_s26 = sshll.u32 %s1402_s25, 4  ;;  %s1049_s26 = int_to_ptr.vmem [resolvable:$true] %s1048_s26 }
  0x27   :  { %520 = vmatpush1.bf16.msra.mxu0 %v1259_v27  ;;  %v1273_v32 = vld [vmem:[%s1829_s5 + $0x44] ss:$16 sps:$4 sm:$0xff]   ;;  %v1271_v33 = vld [vmem:[%s1829_s5 + $0x40] ss:$16 sps:$4 sm:$0xff]   ;;  %v1262_v53 = vld [vmem:[%s1829_s5 + $0x8] ss:$16 sps:$4 sm:$0xff]   ;;  %p1380_p1 = scmp.lt.s32.totalorder %s1049_s26, %s1049_s26 }
  0x28   :  { %521 = vmatprep.subr.bf16.mxu0 %v1267_v30  ;;  %v1279_v34 = vld [vmem:[%s1829_s5 + $0x64] ss:$16 sps:$4 sm:$0xff]   ;;  %v1277_v35 = vld [vmem:[%s1829_s5 + $0x60] ss:$16 sps:$4 sm:$0xff]   ;;  %v1588_v44 = vsub.s32 0, %v1585_v43  ;;  %v1650_v8 = vsub.s32 1, %v1585_v43 }
  0x29   :  { %1210 = vmatpush3.bf16.msra.mxu1 %v1258_v26  ;;  %v1285_v36 = vld [vmem:[%s1829_s5 + $0x84] ss:$16 sps:$4 sm:$0xff]   ;;  %v1283_v37 = vld [vmem:[%s1829_s5 + $0x80] ss:$16 sps:$4 sm:$0xff]   ;;  %v1270_v55 = vld [vmem:[%s1829_s5 + $0x2c] ss:$16 sps:$4 sm:$0xff]  }
  0x2a   :  { %560 = vmatprep.subr.bf16.mxu1 %v1264_v29  ;;  %v1291_v38 = vld [vmem:[%s1829_s5 + $0xa4] ss:$16 sps:$4 sm:$0xff]   ;;  %v1289_v39 = vld [vmem:[%s1829_s5 + $0xa0] ss:$16 sps:$4 sm:$0xff]   ;;  %v1268_v56 = vld [vmem:[%s1829_s5 + $0x28] ss:$16 sps:$4 sm:$0xff]  }
  0x2b   :  { %522 = vmatpush1.bf16.msra.mxu0 %v1265_v31  ;;  %v1297_v40 = vld [vmem:[%s1829_s5 + $0xc4] ss:$16 sps:$4 sm:$0xff]   ;;  %v1295_v41 = vld [vmem:[%s1829_s5 + $0xc0] ss:$16 sps:$4 sm:$0xff]   ;;  %v1276_v57 = vld [vmem:[%s1829_s5 + $0x4c] ss:$16 sps:$4 sm:$0xff]  }
  0x2c   :  { %523 = vmatprep.subr.bf16.mxu0 %v1273_v32  ;;  %v57_v45 = vld [vmem:[%s1826_s2] sm:$0x3]  ;;  %v1274_v58 = vld [vmem:[%s1829_s5 + $0x48] ss:$16 sps:$4 sm:$0xff]   ;;  %v1282_v59 = vld [vmem:[%s1829_s5 + $0x6c] ss:$16 sps:$4 sm:$0xff]  }
  0x2d   :  { %v62_v46 = vrot.slane %v57_v45, %v1588_v44  ;;  %v1280_v60 = vld [vmem:[%s1829_s5 + $0x68] ss:$16 sps:$4 sm:$0xff]   ;;  %v1288_v61 = vld [vmem:[%s1829_s5 + $0x8c] ss:$16 sps:$4 sm:$0xff]   ;;  %v1303_v3 = vld [vmem:[%s1829_s5 + $0xe4] ss:$16 sps:$4 sm:$0xff]   ;;  %v66_v9 = vrot.slane %v57_v45, %v1650_v8 }
  0x2e   :  { %v1286_v62 = vld [vmem:[%s1829_s5 + $0x88] ss:$16 sps:$4 sm:$0xff]   ;;  %v1294_v63 = vld [vmem:[%s1829_s5 + $0xac] ss:$16 sps:$4 sm:$0xff]   ;;  %v1301_v5 = vld [vmem:[%s1829_s5 + $0xe0] ss:$16 sps:$4 sm:$0xff]  }
  0x2f   :  { %524 = vmatpush1.bf16.msra.mxu0 %v1271_v33  ;;  %v1292_v0 = vld [vmem:[%s1829_s5 + $0xa8] ss:$16 sps:$4 sm:$0xff]   ;;  %v1300_v1 = vld [vmem:[%s1829_s5 + $0xcc] ss:$16 sps:$4 sm:$0xff]   ;;  %v1072_v10 = vld [vmem:[%s1828_s4] ss:$0 sm:$0xff] }
  0x30   :  { %525 = vmatprep.subr.bf16.mxu0 %v1279_v34  ;;  %v1306_v4 = vld [vmem:[%s1829_s5 + $0xec] ss:$16 sps:$4 sm:$0xff]   ;;  %v1304_v6 = vld [vmem:[%s1829_s5 + $0xe8] ss:$16 sps:$4 sm:$0xff]   ;;  %s1375_s27 = scalar_lea.vmem %s1049_s26, 32 }
  0x31   :  { %v1309_v7 = vld [vmem:[%s1831_s7 + $0x4] ss:$8 sps:$4 sm:$0xff]   ;;  %v1307_v18 = vld [vmem:[%s1831_s7] ss:$8 sps:$4 sm:$0xff]   ;;  %v1312_v20 = vld [vmem:[%s1831_s7 + $0x14] ss:$8 sps:$4 sm:$0xff]   ;;  %p1376_p0 = scmp.ne.s32.totalorder %s1049_s26, %s1375_s27  ;;  %p1381_p2 = scmp.lt.s32.totalorder %s1375_s27, %s1375_s27 }
  0x32   :  { %v1310_v21 = vld [vmem:[%s1831_s7 + $0x10] ss:$8 sps:$4 sm:$0xff]   ;;  %v1315_v22 = vld [vmem:[%s1831_s7 + $0x24] ss:$8 sps:$4 sm:$0xff]   ;;  %v1313_v23 = vld [vmem:[%s1831_s7 + $0x20] ss:$8 sps:$4 sm:$0xff]  }
  0x33   :  { %526 = vmatpush1.bf16.msra.mxu0 %v1277_v35  ;;  %v1318_v24 = vld [vmem:[%s1831_s7 + $0x34] ss:$8 sps:$4 sm:$0xff]   ;;  %v1316_v25 = vld [vmem:[%s1831_s7 + $0x30] ss:$8 sps:$4 sm:$0xff]   ;;  %v1321_v26 = vld [vmem:[%s1831_s7 + $0x44] ss:$8 sps:$4 sm:$0xff]   ;;  %p1382_p3 = por %p1381_p2, %p1380_p1 }
  0x34   :  { %527 = vmatprep.subr.bf16.mxu0 %v1285_v36  ;;  %v1319_v27 = vld [vmem:[%s1831_s7 + $0x40] ss:$8 sps:$4 sm:$0xff]   ;;  %v1324_v28 = vld [vmem:[%s1831_s7 + $0x54] ss:$8 sps:$4 sm:$0xff]   ;;  %v1322_v29 = vld [vmem:[%s1831_s7 + $0x50] ss:$8 sps:$4 sm:$0xff]  }
  0x35   :  { %v1327_v30 = vld [vmem:[%s1831_s7 + $0x64] ss:$8 sps:$4 sm:$0xff]   ;;  %v1325_v31 = vld [vmem:[%s1831_s7 + $0x60] ss:$8 sps:$4 sm:$0xff]   ;;  %v1330_v32 = vld [vmem:[%s1831_s7 + $0x74] ss:$8 sps:$4 sm:$0xff]   ;;  %p1383_p4 = pnand %p1382_p3, %p1376_p0 }
  0x36   :  { %v1328_v33 = vld [vmem:[%s1831_s7 + $0x70] ss:$8 sps:$4 sm:$0xff]   ;;  %v1333_v34 = vld [vmem:[%s1831_s7 + $0x84] ss:$8 sps:$4 sm:$0xff]   ;;  %v1331_v35 = vld [vmem:[%s1831_s7 + $0x80] ss:$8 sps:$4 sm:$0xff]  }
  0x37   :  { %528 = vmatpush1.bf16.msra.mxu0 %v1283_v37  ;;  %v1336_v36 = vld [vmem:[%s1831_s7 + $0x94] ss:$8 sps:$4 sm:$0xff]   ;;  %v1334_v37 = vld [vmem:[%s1831_s7 + $0x90] ss:$8 sps:$4 sm:$0xff]   ;;  %v1345_v42 = vld [vmem:[%s1831_s7 + $0xc4] ss:$8 sps:$4 sm:$0xff]  }
  0x38   :  { %529 = vmatprep.subr.bf16.mxu0 %v1291_v38  ;;  %v1339_v38 = vld [vmem:[%s1831_s7 + $0xa4] ss:$8 sps:$4 sm:$0xff]   ;;  %v1343_v45 = vld [vmem:[%s1831_s7 + $0xc0] ss:$8 sps:$4 sm:$0xff]  }
  0x3b   :  { %530 = vmatpush1.bf16.msra.mxu0 %v1289_v39  ;;  %v1337_v39 = vld [vmem:[%s1831_s7 + $0xa0] ss:$8 sps:$4 sm:$0xff]  }
  0x3c   :  { %531 = vmatprep.subr.bf16.mxu0 %v1297_v40  ;;  %v1342_v40 = vld [vmem:[%s1831_s7 + $0xb4] ss:$8 sps:$4 sm:$0xff]  }
  0x3f   :  { %532 = vmatpush1.bf16.msra.mxu0 %v1295_v41  ;;  %v1340_v41 = vld [vmem:[%s1831_s7 + $0xb0] ss:$8 sps:$4 sm:$0xff]  }
  0x40   :  { %533 = vmatprep.subr.bf16.mxu0 %v1303_v3 }
  0x43   :  { %534 = vmatpush1.bf16.msra.mxu0 %v1301_v5  ;;  %v1359_v5 = vld [vmem:[%s1833_s9 + $0x50] sm:$0xff]  }
  0xf5   :  { %v183_v47 = vpop.f32.mrb[0].mxu0 }
  0xf6   :  { %v184_v48 = vadd.f32 %v183_v47, %v62_v46  ;;  %v185_v49 = vpop.f32.mrb[1].mxu0  ;;  %v1348_v46 = vld [vmem:[%s1831_s7 + $0xd4] ss:$8 sps:$4 sm:$0xff]   ;;  %v1346_v47 = vld [vmem:[%s1831_s7 + $0xd0] ss:$8 sps:$4 sm:$0xff]  }
  0xf7   :  { %v187_v50 = vpop.f32.mrb[2].mxu0  ;;  %v186_v12 = vadd.f32 %v185_v49, %v66_v9  ;;  %v1349_v49 = vld [vmem:[%s1831_s7 + $0xe0] ss:$8 sps:$4 sm:$0xff]   ;;  %v1362_v9 = vld [vmem:[%s1833_s9 + $0x18] sm:$0xff]  }
  0xf8   :  { %v190_v51 = vmax.f32 %v184_v48, 0.0  ;;  %v188_v52 = vpop.f32.mrb[3].mxu0  ;;  %v1351_v48 = vld [vmem:[%s1831_s7 + $0xe4] ss:$8 sps:$4 sm:$0xff]   ;;  %v1354_v50 = vld [vmem:[%s1831_s7 + $0xf4] ss:$8 sps:$4 sm:$0xff]  }
  0xf9   :  { %v1355_v52 = vld [vmem:[%s1833_s9 + $0x40] sm:$0xff]  }
  0xfa   :  { %v191_v54 = vpack.c.bf16 %v190_v51, %v190_v51  ;;  %v1352_v51 = vld [vmem:[%s1831_s7 + $0xf0] ss:$8 sps:$4 sm:$0xff]   ;;  %1173 = vmatprep.subr.bf16.mxu0 %v1355_v52 }
  0xfc   :  { %1212 = vmatmul.mubr.bf16.vlgmr.msra.gmra.mrb[0].mxu1 %v191_v54  ;;  %v1357_v54 = vld [vmem:[%s1833_s9 + $0x48] sm:$0xff]  }
  0xfd   :  { %561 = vmatpush1.bf16.msra.mxu1 %v1262_v53  ;;  %592 = vmatprep.mubr.bf16.mxu1 %v1399_v2  ;;  %v1298_v2 = vld [vmem:[%s1829_s5 + $0xc8] ss:$16 sps:$4 sm:$0xff]   ;;  %v1356_v53 = vld [vmem:[%s1833_s9] sm:$0xff]  }
  0xfe   :  { %562 = vmatprep.subr.bf16.mxu1 %v1270_v55  ;;  %v1358_v55 = vld [vmem:[%s1833_s9 + $0x8] sm:$0xff]  }
 0x101   :  { %563 = vmatpush1.bf16.msra.mxu1 %v1268_v56  ;;  %v337_v56 = vld [vmem:[%s1830_s6] sm:$0xf] }
 0x102   :  { %564 = vmatprep.subr.bf16.mxu1 %v1276_v57  ;;  %v342_v57 = vrot.slane %v337_v56, %v1588_v44 }
 0x105   :  { %565 = vmatpush1.bf16.msra.mxu1 %v1274_v58  ;;  %v346_v58 = vrot.slane %v337_v56, %v1650_v8 }
 0x106   :  { %566 = vmatprep.subr.bf16.mxu1 %v1282_v59 }
 0x109   :  { %567 = vmatpush1.bf16.msra.mxu1 %v1280_v60 }
 0x10a   :  { %568 = vmatprep.subr.bf16.mxu1 %v1288_v61 }
 0x10d   :  { %569 = vmatpush1.bf16.msra.mxu1 %v1286_v62 }
 0x10e   :  { %570 = vmatprep.subr.bf16.mxu1 %v1294_v63 }
 0x111   :  { %571 = vmatpush1.bf16.msra.mxu1 %v1292_v0 }
 0x112   :  { %572 = vmatprep.subr.bf16.mxu1 %v1300_v1 }
 0x115   :  { %573 = vmatpush1.bf16.msra.mxu1 %v1298_v2 }
 0x116   :  { %574 = vmatprep.subr.bf16.mxu1 %v1306_v4 }
 0x119   :  { %575 = vmatpush1.bf16.msra.mxu1 %v1304_v6  ;;  %v1360_v6 = vld [vmem:[%s1833_s9 + $0x10] sm:$0xff]  }
 0x11a   :  { %809 = vmatprep.subr.bf16.mxu1 %v1309_v7  ;;  %v1361_v7 = vld [vmem:[%s1833_s9 + $0x58] sm:$0xff]  }
 0x1cf   :  { %v297_v11 = vpop.f32.mrb[0].mxu1 }
 0x1d0   :  { %v298_v13 = vadd.f32 %v1072_v10, %v297_v11  ;;  %v1213_v14 = vpop.f32.mrb[1].mxu1  ;;  %v1363_v10 = vld [vmem:[%s1833_s9 + $0x60] sm:$0xff]  }
 0x1d1   :  { %v300_v15 = vpop.f32.mrb[2].mxu1  ;;  %v1364_v11 = vld [vmem:[%s1833_s9 + $0x20] sm:$0xff]   ;;  %v1367_v14 = vld [vmem:[%s1833_s9 + $0x70] sm:$0xff]  }
 0x1d2   :  { %v303_v16 = vadd.f32 %v298_v13, %v186_v12  ;;  %v1214_v17 = vpop.f32.mrb[3].mxu1  ;;  %v1365_v12 = vld [vmem:[%s1833_s9 + $0x68] sm:$0xff]   ;;  %v1368_v15 = vld [vmem:[%s1833_s9 + $0x30] sm:$0xff]  }
 0x1d3   :  { %v1366_v13 = vld [vmem:[%s1833_s9 + $0x28] sm:$0xff]   ;;  %v1370_v17 = vld [vmem:[%s1833_s9 + $0x38] sm:$0xff]  }
 0x1d4   :  { %v304_v19 = vpack.c.bf16 %v303_v16, %v303_v16  ;;  %v1369_v16 = vld [vmem:[%s1833_s9 + $0x78] sm:$0xff]  }
 0x1d6   :  { %552 = vmatmul.mubr.bf16.vlgmr.msra.gmra.mrb[4].mxu0 %v304_v19  ;;  %593 = vmatmul.mubr.bf16.vlgmr.msra.gmra.mrb[4].mxu1 %v304_v19  ;;  %v637_v19 = vld [vmem:[%s1832_s8] sm:$0x3] }
 0x1d7   :  { %810 = vmatpush1.bf16.msra.mxu1 %v1307_v18  ;;  %1174 = vmatpush3.bf16.msra.mxu0 %v1356_v53  ;;  %v349_v18 = vsub.s32 2, %v1585_v43 }
 0x1d8   :  { %811 = vmatprep.subr.bf16.mxu1 %v1312_v20  ;;  %1175 = vmatprep.subr.bf16.mxu0 %v1357_v54  ;;  %v353_v20 = vsub.s32 3, %v1585_v43 }
 0x1db   :  { %812 = vmatpush1.bf16.msra.mxu1 %v1310_v21  ;;  %1176 = vmatpush3.bf16.msra.mxu0 %v1358_v55  ;;  %v350_v21 = vrot.slane %v337_v56, %v349_v18 }
 0x1dc   :  { %813 = vmatprep.subr.bf16.mxu1 %v1315_v22  ;;  %1177 = vmatprep.subr.bf16.mxu0 %v1359_v5  ;;  %v642_v22 = vrot.slane %v637_v19, %v1588_v44 }
 0x1df   :  { %814 = vmatpush1.bf16.msra.mxu1 %v1313_v23  ;;  %1178 = vmatpush3.bf16.msra.mxu0 %v1360_v6  ;;  %v354_v23 = vrot.slane %v337_v56, %v353_v20 }
 0x1e0   :  { %815 = vmatprep.subr.bf16.mxu1 %v1318_v24  ;;  %1179 = vmatprep.subr.bf16.mxu0 %v1361_v7  ;;  %v646_v24 = vrot.slane %v637_v19, %v1650_v8 }
 0x1e3   :  { %816 = vmatpush1.bf16.msra.mxu1 %v1316_v25  ;;  %1180 = vmatpush3.bf16.msra.mxu0 %v1362_v9  ;;  %v1215_v25 = vadd.f32 %v642_v22, %v350_v21 }
 0x1e4   :  { %817 = vmatprep.subr.bf16.mxu1 %v1321_v26  ;;  %1181 = vmatprep.subr.bf16.mxu0 %v1363_v10  ;;  %v1217_v26 = vadd.f32 %v646_v24, %v354_v23 }
 0x1e7   :  { %818 = vmatpush1.bf16.msra.mxu1 %v1319_v27  ;;  %1182 = vmatpush3.bf16.msra.mxu0 %v1364_v11 }
 0x1e8   :  { %819 = vmatprep.subr.bf16.mxu1 %v1324_v28  ;;  %1183 = vmatprep.subr.bf16.mxu0 %v1365_v12 }
 0x1eb   :  { %820 = vmatpush1.bf16.msra.mxu1 %v1322_v29  ;;  %1184 = vmatpush3.bf16.msra.mxu0 %v1366_v13 }
 0x1ec   :  { %821 = vmatprep.subr.bf16.mxu1 %v1327_v30  ;;  %1185 = vmatprep.subr.bf16.mxu0 %v1367_v14 }
 0x1ef   :  { %822 = vmatpush1.bf16.msra.mxu1 %v1325_v31  ;;  %1186 = vmatpush3.bf16.msra.mxu0 %v1368_v15 }
 0x1f0   :  { %823 = vmatprep.subr.bf16.mxu1 %v1330_v32  ;;  %1187 = vmatprep.subr.bf16.mxu0 %v1369_v16 }
 0x1f3   :  { %824 = vmatpush1.bf16.msra.mxu1 %v1328_v33  ;;  %1188 = vmatpush3.bf16.msra.mxu0 %v1370_v17 }
 0x1f4   :  { %825 = vmatprep.subr.bf16.mxu1 %v1333_v34 }
 0x1f7   :  { %826 = vmatpush1.bf16.msra.mxu1 %v1331_v35 }
 0x1f8   :  { %827 = vmatprep.subr.bf16.mxu1 %v1336_v36 }
 0x1fb   :  { %828 = vmatpush1.bf16.msra.mxu1 %v1334_v37 }
 0x1fc   :  { %829 = vmatprep.subr.bf16.mxu1 %v1339_v38 }
 0x1ff   :  { %830 = vmatpush1.bf16.msra.mxu1 %v1337_v39 }
 0x200   :  { %831 = vmatprep.subr.bf16.mxu1 %v1342_v40 }
 0x203   :  { %832 = vmatpush1.bf16.msra.mxu1 %v1340_v41 }
 0x204   :  { %833 = vmatprep.subr.bf16.mxu1 %v1345_v42 }
 0x207   :  { %834 = vmatpush1.bf16.msra.mxu1 %v1343_v45 }
 0x208   :  { %835 = vmatprep.subr.bf16.mxu1 %v1348_v46  ;;  %v1147_v46 = vld [vmem:[%s1834_s10] ss:$0 sm:$0xff] }
 0x20b   :  { %836 = vmatpush1.bf16.msra.mxu1 %v1346_v47 }
 0x20c   :  { %837 = vmatprep.subr.bf16.mxu1 %v1351_v48 }
 0x20f   :  { %838 = vmatpush1.bf16.msra.mxu1 %v1349_v49 }
 0x210   :  { %839 = vmatprep.subr.bf16.mxu1 %v1354_v50 }
 0x213   :  { %840 = vmatpush1.bf16.msra.mxu1 %v1352_v51 }
 0x2a9   :  { %v553_v59 = vpop.f32.mrb[4].mxu0 }
 0x2aa   :  { %v554_v60 = vadd.f32 %v553_v59, %v342_v57  ;;  %v555_v61 = vpop.f32.mrb[5].mxu0 }
 0x2ab   :  { %v556_v62 = vadd.f32 %v555_v61, %v346_v58  ;;  %v557_v63 = vpop.f32.mrb[6].mxu0 }
 0x2ac   :  { %v601_v0 = vmax.f32 %v554_v60, 0.0  ;;  %v558_v1 = vpop.f32.mrb[7].mxu0 }
 0x2ad   :  { %v602_v2 = vmax.f32 %v556_v62, 0.0 }
 0x2ae   :  { %v603_v4 = vpack.c.bf16 %v601_v0, %v601_v0 }
 0x2af   :  { %v604_v3 = vpack.c.bf16 %v602_v2, %v602_v2 }
 0x2b1   :  { %841 = vmatprep.mubr.bf16.mxu1 %v604_v3 }
 0x2b2   :  { %842 = vmatmul.mubr.bf16.vlgmr.msra.gmra.mrb[4].mxu1 %v603_v4 }
 0x385   :  { %v843_v27 = vpop.f32.mrb[4].mxu1 }
 0x386   :  { %v1216_v28 = vadd.f32 %v1215_v25, %v843_v27  ;;  %v845_v29 = vpop.f32.mrb[5].mxu1 }
 0x387   :  { %v1218_v30 = vadd.f32 %v1217_v26, %v845_v29  ;;  %v847_v31 = vpop.f32.mrb[6].mxu1 }
 0x388   :  { %v854_v32 = vmin.f32 %v1216_v28, 0.0  ;;  %v848_v33 = vpop.f32.mrb[7].mxu1  ;;  %vm852_vm1 = vcmp.gt.f32.partialorder %v1216_v28, 0.0 }
 0x389   :  { %v855_v34 = vmin.f32 %v1218_v30, 0.0  ;;  %vm853_vm2 = vcmp.gt.f32.partialorder %v1218_v30, 0.0 }
 0x38a   :  { %v856_v35 = vmul.f32 1.442695, %v854_v32 }
 0x38b   :  { %v858_v36 = vmul.f32 1.442695, %v855_v34 }
 0x38c   :  { %1371 = vpow2.f32 %v856_v35 }
 0x38d   :  { %1373 = vpow2.f32 %v858_v36 }
 0x396   :  { %v1372_v43 = vpop.eup %1371 }
 0x397   :  { %v1374_v37 = vpop.eup %1373  ;;  %v1145_v44 = vadd.f32 -1.0, %v1372_v43 }
 0x398   :  { %v1146_v38 = vadd.f32 -1.0, %v1374_v37 }
 0x399   :  { %v862_v8 = vsel %vm852_vm1, %v1216_v28, %v1145_v44 }
 0x39a   :  { %v863_v39 = vsel %vm853_vm2, %v1218_v30, %v1146_v38  ;;  %v864_v41 = vpack.c.bf16 %v862_v8, %v862_v8 }
 0x39b   :  { %v865_v40 = vpack.c.bf16 %v863_v39, %v863_v39 }
 0x39d   :  { %1033 = vmatprep.mubr.bf16.mxu0 %v865_v40 }
 0x39e   :  { %1034 = vmatmul.mubr.bf16.vlgmr.msra.gmra.mrb[8].mxu0 %v864_v41 }
 0x471   :  { %v1189_v42 = vpop.f32.mrb[8].mxu0 }
 0x472   :  { %v1190_v45 = vpop.f32.mrb[9].mxu0 }
 0x473   :  { %v1191_v47 = vadd.f32 %v1190_v45, %v1189_v42  ;;  %v1192_v48 = vpop.f32.mrb[10].mxu0 }
 0x474   :  { %v1193_v49 = vpop.f32.mrb[11].mxu0 }
 0x475   :  { %v1036_v50 = vadd.f32 %v1191_v47, %v1147_v46 }
 0x477   :  { %1041 = vst [vmem:[#allocation2] sm:$0x3] %v1036_v50 }
 0x478   :  { %1386 = shalt.err (!%p1383_p4)
}
 0x479   :  { %s1387_s28 = scalar_lea.hbm %s1835_s11, 32 }
 0x47a   :  { %p1388_p5 = scmp.ne.s32.totalorder %s1835_s11, %s1387_s28  ;;  %p1391_p6 = scmp.lt.u32.totalorder %s1387_s28, %s1835_s11 }
 0x47c   :  { %p1393_p7 = pnand %p1391_p6, %p1388_p5 }
 0x47e   :  { %1396 = shalt.err (!%p1393_p7)
}
 0x47f   :  { %1051 = dma.vmem_to_hbm [thread:$0]  %s1049_s26, 32, %s1835_s11, [#allocation3]  }
 0x480   :  { %1397 = dma.done.wait [#allocation3], 32  }
 0x481   :  { %1398 = vsyncadd [#allocation3], 4294967264 }
 0x482   :  { %1055 = vsyncpa [#allocation3], 1 }

</bundles_post_ra>
